<compile_context>
chip_gen: v5e
topology: v5e:2x2
jax: 0.10.0
libtpu: 0.0.40
codegen_flags: <defaults>
</compile_context>

<pallas_src>
import functools

import jax
import jax.numpy as jnp
from jax.experimental import pallas as pl
from jax.experimental.pallas import tpu as pltpu

_LANE = 128


def _round_up(n: int, m: int) -> int:
    return ((n + m - 1) // m) * m


def _decoder_kernel(x_ref, w1_ref, b1_ref, w2_ref, b2_ref, w3_ref, b3_ref,
                    o_ref, *, image_dim: int):
    # layer 1: relu(x @ W1 + b1)   (bf16 operands, f32 MXU accumulation)
    x = x_ref[...].astype(jnp.bfloat16)
    h1 = jnp.dot(x, w1_ref[...], preferred_element_type=jnp.float32)
    h1 = jnp.maximum(h1 + b1_ref[...], 0.0)
    # layer 2: relu(h1 @ W2 + b2)
    h2 = jnp.dot(h1.astype(jnp.bfloat16), w2_ref[...],
                 preferred_element_type=jnp.float32)
    h2 = jnp.maximum(h2 + b2_ref[...], 0.0)
    # layer 3: sigmoid(h2 @ W3 + b3)
    # W3 is lane-padded (784 -> 896) for clean MXU N-tiling; drop the dead
    # columns BEFORE the bias add / sigmoid / store so no EUP or writeback
    # work is spent on them.
    logits = jnp.dot(h2.astype(jnp.bfloat16), w3_ref[...],
                     preferred_element_type=jnp.float32)
    logits = logits[:, :image_dim] + b3_ref[...]
    o_ref[...] = jax.nn.sigmoid(logits).astype(o_ref.dtype)


def prepare_decoder_params(params):
    """One-time prep: transpose to [in,out], cast weights to bf16, lane-pad the
    layer-3 weight to a 128 multiple, reshape biases to [1, out] rows."""
    w1, b1, w2, b2, w3, b3 = (params[k] for k in ("w1", "b1", "w2", "b2", "w3", "b3"))
    image_dim = w3.shape[0]
    out_pad = _round_up(image_dim, _LANE)

    w3t = jnp.pad(w3.T, ((0, 0), (0, out_pad - image_dim)))

    return {
        "w1": w1.T.astype(jnp.bfloat16), "b1": b1[None, :].astype(jnp.float32),
        "w2": w2.T.astype(jnp.bfloat16), "b2": b2[None, :].astype(jnp.float32),
        "w3": w3t.astype(jnp.bfloat16),  "b3": b3[None, :].astype(jnp.float32),
        "image_dim": image_dim,
    }


def _pick_tile(B: int, target: int = 512) -> int:
    """Batch-tile heuristic: ~512 rows/step for large B, >=2 steps when the
    batch is big enough to split across v7x's two TensorCores, and tiles sized
    from the step count so awkward batches don't pad ~2x."""
    n_steps = pl.cdiv(B, target)
    if n_steps < 2 and B >= 256:
        n_steps = 2
    return _round_up(pl.cdiv(B, n_steps), 8)


def decoder_forward(x, prepped, *, tm=None, out_dtype=jnp.bfloat16):
    """x: [B, latent_dim] float32; prepped: output of prepare_decoder_params.

    Returns [B, image_dim] in `out_dtype` (bf16 by default: sigmoid outputs in
    [0,1] keep ~3 significant digits; upcast downstream if the loss needs f32).
    """
    w1, b1 = prepped["w1"], prepped["b1"]
    w2, b2 = prepped["w2"], prepped["b2"]
    w3, b3 = prepped["w3"], prepped["b3"]
    image_dim = prepped["image_dim"]

    B, latent = x.shape

    if tm is None:
        tm = _pick_tile(B)
    b_pad = _round_up(B, tm)
    if b_pad != B:
        x = jnp.pad(x, ((0, b_pad - B), (0, 0)))

    resident = lambda shape: pl.BlockSpec(shape, lambda i: (0, 0))

    out = pl.pallas_call(
        functools.partial(_decoder_kernel, image_dim=image_dim),
        # Lane-exact output (last dim == full array dim is legal for BlockSpec):
        # no padded columns written, no second XLA slice pass over HBM.
        out_shape=jax.ShapeDtypeStruct((b_pad, image_dim), out_dtype),
        grid=(b_pad // tm,),
        in_specs=[
            pl.BlockSpec((tm, latent), lambda i: (i, 0)),    # x: streamed per tile
            resident(w1.shape), resident(b1.shape),           # weights/biases: VMEM-resident
            resident(w2.shape), resident(b2.shape),
            resident(w3.shape), resident(b3.shape),
        ],
        out_specs=pl.BlockSpec((tm, image_dim), lambda i: (i, 0)),
        compiler_params=pltpu.CompilerParams(
            dimension_semantics=("parallel",),   # megacore sharding on v7x
            vmem_limit_bytes=32 << 20,
        ),
    )(x, w1, b1, w2, b2, w3, b3)

    if b_pad != B:
        out = out[:B]
    return out


def init_decoder_params(key, image_dim: int, latent_dim: int):
    """Deterministic synthetic init, PyTorch-style shapes ([out, in] weights)."""
    dims = [(256, latent_dim), (512, 256), (image_dim, 512)]
    params = {}
    for i, (out_f, in_f) in enumerate(dims, start=1):
        key, kw, kb = jax.random.split(key, 3)
        bound = 1.0 / jnp.sqrt(in_f)
        params[f"w{i}"] = jax.random.uniform(
            kw, (out_f, in_f), jnp.float32, minval=-bound, maxval=bound)
        params[f"b{i}"] = jax.random.uniform(
            kb, (out_f,), jnp.float32, minval=-bound, maxval=bound)
    return params


def decoder_reference(x, params):
    """Plain-JAX f32 reference of the PyTorch forward."""
    h = jnp.maximum(x @ params["w1"].T + params["b1"], 0.0)
    h = jnp.maximum(h @ params["w2"].T + params["b2"], 0.0)
    return jax.nn.sigmoid(h @ params["w3"].T + params["b3"])


if __name__ == "__main__":
    image_dim = 784   # 28*28
    latent_dim = 20
    batch = 8

    key = jax.random.PRNGKey(0)
    key, kx = jax.random.split(key)
    x = jax.random.normal(kx, (batch, latent_dim), jnp.float32)
    params = init_decoder_params(key, image_dim, latent_dim)

    prepped = prepare_decoder_params(params)   # one-time weight layout/cast/pad
    out = decoder_forward(x, prepped)
    out = jax.block_until_ready(out)

    ref = decoder_reference(x, params)
    assert out.shape == (batch, image_dim), out.shape
    # bf16 matmul operands + bf16 output with f32 accumulation -> loosened
    # tolerance vs the f32 reference.
    diff = jnp.max(jnp.abs(out.astype(jnp.float32) - ref))
    assert jnp.allclose(out.astype(jnp.float32), ref, atol=2e-2, rtol=2e-2), (
        "mismatch vs reference, max abs diff = %e" % float(diff))

    print("KERNEL_OK")
</pallas_src>

<mosaic_0001>
module attributes {stable_mosaic.version = 11 : i64} {
  func.func @_decoder_kernel(%arg0: i32, %arg1: memref<8x20xf32, #tpu.memory_space<vmem>>, %arg2: memref<20x256xbf16, #tpu.memory_space<vmem>>, %arg3: memref<1x256xf32, #tpu.memory_space<vmem>>, %arg4: memref<256x512xbf16, #tpu.memory_space<vmem>>, %arg5: memref<1x512xf32, #tpu.memory_space<vmem>>, %arg6: memref<512x896xbf16, #tpu.memory_space<vmem>>, %arg7: memref<1x784xf32, #tpu.memory_space<vmem>>, %arg8: memref<8x784xbf16, #tpu.memory_space<vmem>>) attributes {dimension_semantics = [#tpu.dimension_semantics<parallel>], iteration_bounds = array<i64: 1>, scalar_prefetch = 0 : i64, scratch_operands = 0 : i64, tpu.core_type = #tpu.core_type<tc>, window_params = [{transform_indices = @transform_0, window_bounds = array<i64: 8, 20>}, {pipeline_mode = #tpu.pipeline_mode<synchronous>, transform_indices = @transform_1, window_bounds = array<i64: 20, 256>}, {pipeline_mode = #tpu.pipeline_mode<synchronous>, transform_indices = @transform_2, window_bounds = array<i64: 1, 256>}, {pipeline_mode = #tpu.pipeline_mode<synchronous>, transform_indices = @transform_3, window_bounds = array<i64: 256, 512>}, {pipeline_mode = #tpu.pipeline_mode<synchronous>, transform_indices = @transform_4, window_bounds = array<i64: 1, 512>}, {pipeline_mode = #tpu.pipeline_mode<synchronous>, transform_indices = @transform_5, window_bounds = array<i64: 512, 896>}, {pipeline_mode = #tpu.pipeline_mode<synchronous>, transform_indices = @transform_6, window_bounds = array<i64: 1, 784>}, {transform_indices = @transform_7, window_bounds = array<i64: 8, 784>}]} {
    %c0 = arith.constant 0 : index
    %c0_0 = arith.constant 0 : index
    %0 = vector.load %arg1[%c0, %c0_0] : memref<8x20xf32, #tpu.memory_space<vmem>>, vector<8x20xf32>
    %1 = arith.truncf %0 : vector<8x20xf32> to vector<8x20xbf16>
    %c0_1 = arith.constant 0 : index
    %c0_2 = arith.constant 0 : index
    %2 = vector.load %arg2[%c0_1, %c0_2] : memref<20x256xbf16, #tpu.memory_space<vmem>>, vector<20x256xbf16>
    %cst = arith.constant dense<0.000000e+00> : vector<8x256xf32>
    %3 = tpu.matmul %1, %2, %cst {dimension_numbers = #tpu.dot_dimension_numbers<[1], [0], [0], [1], [0, 0, 1, 1], [], []>} : vector<8x20xbf16>, vector<20x256xbf16>, vector<8x256xf32> -> vector<8x256xf32>
    %c0_3 = arith.constant 0 : index
    %c0_4 = arith.constant 0 : index
    %4 = vector.load %arg3[%c0_3, %c0_4] : memref<1x256xf32, #tpu.memory_space<vmem>>, vector<1x256xf32>
    %5 = vector.broadcast %4 : vector<1x256xf32> to vector<8x256xf32>
    %6 = arith.addf %3, %5 : vector<8x256xf32>
    %cst_5 = arith.constant 0.000000e+00 : f32
    %7 = vector.broadcast %cst_5 : f32 to vector<8x256xf32>
    %8 = arith.maximumf %6, %7 : vector<8x256xf32>
    %9 = arith.truncf %8 : vector<8x256xf32> to vector<8x256xbf16>
    %c0_6 = arith.constant 0 : index
    %c0_7 = arith.constant 0 : index
    %10 = vector.load %arg4[%c0_6, %c0_7] : memref<256x512xbf16, #tpu.memory_space<vmem>>, vector<256x512xbf16>
    %cst_8 = arith.constant dense<0.000000e+00> : vector<8x512xf32>
    %11 = tpu.matmul %9, %10, %cst_8 {dimension_numbers = #tpu.dot_dimension_numbers<[1], [0], [0], [1], [0, 0, 1, 1], [], []>} : vector<8x256xbf16>, vector<256x512xbf16>, vector<8x512xf32> -> vector<8x512xf32>
    %c0_9 = arith.constant 0 : index
    %c0_10 = arith.constant 0 : index
    %12 = vector.load %arg5[%c0_9, %c0_10] : memref<1x512xf32, #tpu.memory_space<vmem>>, vector<1x512xf32>
    %13 = vector.broadcast %12 : vector<1x512xf32> to vector<8x512xf32>
    %14 = arith.addf %11, %13 : vector<8x512xf32>
    %cst_11 = arith.constant 0.000000e+00 : f32
    %15 = vector.broadcast %cst_11 : f32 to vector<8x512xf32>
    %16 = arith.maximumf %14, %15 : vector<8x512xf32>
    %17 = arith.truncf %16 : vector<8x512xf32> to vector<8x512xbf16>
    %c0_12 = arith.constant 0 : index
    %c0_13 = arith.constant 0 : index
    %18 = vector.load %arg6[%c0_12, %c0_13] : memref<512x896xbf16, #tpu.memory_space<vmem>>, vector<512x896xbf16>
    %cst_14 = arith.constant dense<0.000000e+00> : vector<8x896xf32>
    %19 = tpu.matmul %17, %18, %cst_14 {dimension_numbers = #tpu.dot_dimension_numbers<[1], [0], [0], [1], [0, 0, 1, 1], [], []>} : vector<8x512xbf16>, vector<512x896xbf16>, vector<8x896xf32> -> vector<8x896xf32>
    %20 = vector.extract_strided_slice %19 {offsets = [0, 0], sizes = [8, 784], strides = [1, 1]} : vector<8x896xf32> to vector<8x784xf32>
    %c0_15 = arith.constant 0 : index
    %c0_16 = arith.constant 0 : index
    %21 = vector.load %arg7[%c0_15, %c0_16] : memref<1x784xf32, #tpu.memory_space<vmem>>, vector<1x784xf32>
    %22 = vector.broadcast %21 : vector<1x784xf32> to vector<8x784xf32>
    %23 = arith.addf %20, %22 : vector<8x784xf32>
    %24 = arith.negf %23 : vector<8x784xf32>
    %25 = math.exp %24 : vector<8x784xf32>
    %cst_17 = arith.constant 1.000000e+00 : f32
    %26 = vector.broadcast %cst_17 : f32 to vector<8x784xf32>
    %27 = arith.addf %26, %25 : vector<8x784xf32>
    %28 = arith.divf %26, %27 : vector<8x784xf32>
    %29 = arith.truncf %28 : vector<8x784xf32> to vector<8x784xbf16>
    %c0_18 = arith.constant 0 : index
    %c0_19 = arith.constant 0 : index
    %30 = vector.load %arg8[%c0_18, %c0_19] : memref<8x784xbf16, #tpu.memory_space<vmem>>, vector<8x784xbf16>
    tpu.vector_store %arg8[%c0_18, %c0_19], %29 {strides = array<i32>} : memref<8x784xbf16, #tpu.memory_space<vmem>>, vector<8x784xbf16>,
    return
  }
  func.func @transform_0(%arg0: i32) -> (i32, i32) {
    %c0_i32 = arith.constant 0 : i32
    %c0_i32_0 = arith.constant 0 : i32
    return %arg0, %c0_i32 : i32, i32
  }
  func.func @transform_1(%arg0: i32) -> (i32, i32) {
    %c0_i32 = arith.constant 0 : i32
    %c0_i32_0 = arith.constant 0 : i32
    %c0_i32_1 = arith.constant 0 : i32
    return %c0_i32, %c0_i32_0 : i32, i32
  }
  func.func @transform_2(%arg0: i32) -> (i32, i32) {
    %c0_i32 = arith.constant 0 : i32
    %c0_i32_0 = arith.constant 0 : i32
    %c0_i32_1 = arith.constant 0 : i32
    return %c0_i32, %c0_i32_0 : i32, i32
  }
  func.func @transform_3(%arg0: i32) -> (i32, i32) {
    %c0_i32 = arith.constant 0 : i32
    %c0_i32_0 = arith.constant 0 : i32
    %c0_i32_1 = arith.constant 0 : i32
    return %c0_i32, %c0_i32_0 : i32, i32
  }
  func.func @transform_4(%arg0: i32) -> (i32, i32) {
    %c0_i32 = arith.constant 0 : i32
    %c0_i32_0 = arith.constant 0 : i32
    %c0_i32_1 = arith.constant 0 : i32
    return %c0_i32, %c0_i32_0 : i32, i32
  }
  func.func @transform_5(%arg0: i32) -> (i32, i32) {
    %c0_i32 = arith.constant 0 : i32
    %c0_i32_0 = arith.constant 0 : i32
    %c0_i32_1 = arith.constant 0 : i32
    return %c0_i32, %c0_i32_0 : i32, i32
  }
  func.func @transform_6(%arg0: i32) -> (i32, i32) {
    %c0_i32 = arith.constant 0 : i32
    %c0_i32_0 = arith.constant 0 : i32
    %c0_i32_1 = arith.constant 0 : i32
    return %c0_i32, %c0_i32_0 : i32, i32
  }
  func.func @transform_7(%arg0: i32) -> (i32, i32) {
    %c0_i32 = arith.constant 0 : i32
    %c0_i32_0 = arith.constant 0 : i32
    return %arg0, %c0_i32 : i32, i32
  }
}

</mosaic_0001>

<bundles_post_ra>
// kernel: tpu_custom_call.1
= control target key start
LH: loop header
LB: loop body
LE: loop exit
PB: predicated region body
PF: predicated region fallthrough
CT: control target
= control target key end

     0   :  { %12 = vsyncpa [#allocation3], 0  ;;  %s4508_s0 = inlined_call_operand.hbm [shape: f32[8,20], index: 0, kind: input, shape index: {}]   ;;  %s4509_s1 = inlined_call_operand.hbm [shape: bf16[20,256], index: 1, kind: input, shape index: {}]   ;;  %s4510_s2 = inlined_call_operand.hbm [shape: f32[1,256], index: 2, kind: input, shape index: {}]   ;;  %s4511_s3 = inlined_call_operand.hbm [shape: bf16[256,512], index: 3, kind: input, shape index: {}]   ;;  %s4512_s4 = inlined_call_operand.hbm [shape: f32[1,512], index: 4, kind: input, shape index: {}]   ;;  %s4513_s5 = inlined_call_operand.hbm [shape: bf16[512,896], index: 5, kind: input, shape index: {}]   ;;  %s4514_s6 = inlined_call_operand.hbm [shape: f32[1,784], index: 6, kind: input, shape index: {}]   ;;  %s4515_s7 = inlined_call_operand.hbm [shape: bf16[8,784], index: 7, kind: output, shape index: {}]  }
   0x1   :  { %13 = vsyncpa [#allocation6], 0 }
   0x2   :  { %14 = vsyncpa [#allocation9], 0 }
   0x3   :  { %15 = vsyncpa [#allocation12], 0  ;;  %s32_s26 = sshll.u32 %s4509_s1, 4  ;;  %s33_s26 = int_to_ptr.hbm [resolvable:$true] %s32_s26 }
   0x4   :  { %16 = vsyncpa [#allocation4], 0  ;;  %s4362_s27 = smov [#allocation5]   ;;  %s56_s8 = sshll.u32 %s4511_s3, 4  ;;  %s57_s8 = int_to_ptr.hbm [resolvable:$true] %s56_s8 }
   0x5   :  { %s34_s28 = sshll.u32 %s4362_s27, 4  ;;  %s4363_s9 = smov 128   ;;  %s35_s28 = int_to_ptr.vmem [resolvable:$true] %s34_s28 }
   0x6   :  { %s4364_s10 = smov 8   ;;  %s4365_s11 = smov [#allocation8]  }
   0x7   :  { %40 = dma.hbm_to_vmem [thread:$0]  %s33_s26, 384, %s35_s28, [#allocation6], %s4363_s9, %s4363_s9, %s4364_s10  }
   0x8   :  { %s58_s12 = sshll.u32 %s4365_s11, 4  ;;  %s4366_s13 = smov 256   ;;  %s59_s12 = int_to_ptr.vmem [resolvable:$true] %s58_s12 }
   0x9   :  { %s4367_s14 = smov 16   ;;  %s80_s16 = sshll.u32 %s4513_s5, 4  ;;  %s81_s16 = int_to_ptr.hbm [resolvable:$true] %s80_s16 }
   0xa   :  { %64 = dma.hbm_to_vmem [thread:$0]  %s57_s8, 8192, %s59_s12, [#allocation9], %s4366_s13, %s4366_s13, %s4367_s14  }
   0xb   :  { %s4368_s17 = smov [#allocation11]   ;;  %s22_s20 = sshll.u32 %s4508_s0, 4  ;;  %s23_s20 = int_to_ptr.hbm [resolvable:$true] %s22_s20 }
   0xc   :  { %s82_s18 = sshll.u32 %s4368_s17, 4  ;;  %s4369_s21 = smov 448   ;;  %s83_s18 = int_to_ptr.vmem [resolvable:$true] %s82_s18 }
   0xd   :  { %s4370_s22 = smov 28   ;;  %s4371_s23 = smov [#allocation2]  }
   0xe   :  { %88 = dma.hbm_to_vmem [thread:$0]  %s81_s16, 28672, %s83_s18, [#allocation12], %s4369_s21, %s4369_s21, %s4370_s22  }
   0xf   :  { %s24_s24 = sshll.u32 %s4371_s23, 4  ;;  %s46_s27 = sshll.u32 %s4510_s2, 4  ;;  %s25_s24 = int_to_ptr.vmem [resolvable:$true] %s24_s24  ;;  %s47_s27 = int_to_ptr.hbm [resolvable:$true] %s46_s27 }
  0x10   :  { %27 = dma.hbm_to_vmem [thread:$0]  %s23_s20, 128, %s25_s24, [#allocation3]  }
  0x11   :  { %s70_s29 = sshll.u32 %s4512_s4, 4  ;;  %s4372_s30 = smov [#allocation7]   ;;  %s71_s29 = int_to_ptr.hbm [resolvable:$true] %s70_s29 }
  0x12   :  { %s48_s8 = sshll.u32 %s4372_s30, 4  ;;  %s4373_s0 = smov [#allocation10]   ;;  %s49_s8 = int_to_ptr.vmem [resolvable:$true] %s48_s8 }
  0x13   :  { %51 = dma.hbm_to_vmem [thread:$0]  %s47_s27, 32, %s49_s8, [#allocation6]  }
  0x14   :  { %s72_s9 = sshll.u32 %s4373_s0, 4  ;;  %s94_s12 = sshll.u32 %s4514_s6, 4  ;;  %s73_s9 = int_to_ptr.vmem [resolvable:$true] %s72_s9  ;;  %s95_s12 = int_to_ptr.hbm [resolvable:$true] %s94_s12 }
  0x15   :  { %75 = dma.hbm_to_vmem [thread:$0]  %s71_s29, 64, %s73_s9, [#allocation9]  }
  0x16   :  { %s4374_s2 = smov [#allocation13]  }
  0x17   :  { %s96_s13 = sshll.u32 %s4374_s2, 4  ;;  %s97_s13 = int_to_ptr.vmem [resolvable:$true] %s96_s13 }
  0x18   :  { %99 = dma.hbm_to_vmem [thread:$0]  %s95_s12, 112, %s97_s13, [#allocation12]  }
  0x19   :  { %4352 = dma.done.wait [#allocation3], 128  }
  0x1a   :  { %4353 = vsyncadd [#allocation3], 4294967168 }
  0x1b   :  { %4354 = dma.done.wait [#allocation6], 416  }
  0x1c   :  { %4355 = vsyncadd [#allocation6], 4294966880 }
  0x1d   :  { %4356 = dma.done.wait [#allocation9], 8256  }
  0x1e   :  { %4357 = vsyncadd [#allocation9], 4294959040 }
  0x1f   :  { %4358 = dma.done.wait [#allocation12], 28784  }
  0x20   :  { %4359 = vsyncadd [#allocation12], 4294938512  ;;  %v133_v0 = vld [vmem:[#allocation5 + $0x10] sm:$0x33]  ;;  %vm159_vm0 = vcmask 1041408   ;;  %v129_v26 = vld [vmem:[#allocation2] sm:$0xff] }
  0x21   :  { %v147_v1 = vunpack.c.l.b16 %v133_v0  ;;  %v148_v2 = vunpack.c.h.b16 %v133_v0  ;;  %v2661_v3 = vld [vmem:[#allocation5] sm:$0xf]  ;;  %v3829_v4 = vld [vmem:[#allocation5 + $0x4] sm:$0xf0]  ;;  %v3828_v5 = vld [vmem:[#allocation5 + $0x4] sm:$0xf]  ;;  %v130_v38 = vpack.c.bf16 %v129_v26, %v129_v26 }
  0x22   :  { %v2663_v6 = vld [vmem:[#allocation5 + $0x8] sm:$0xf0]  ;;  %v2783_v7 = vld [vmem:[#allocation8 + $0xe0] sm:$0xf]  ;;  %v3858_v14 = vld [vmem:[#allocation8 + $0xe4] sm:$0xf]  ;;  %v2662_v24 = vor.u32 %v3829_v4, %v2661_v3 }
  0x23   :  { %v3860_v8 = vld [vmem:[#allocation8 + $0xec] sm:$0xf0]  ;;  %v2911_v9 = vld [vmem:[#allocation8 + $0x1e0] sm:$0xf]  ;;  %v151_v10 = vpack.c.b16 %v147_v1, %v147_v1  ;;  %v152_v11 = vpack.c.b16 %v148_v2, %v148_v2  ;;  %v2785_v15 = vld [vmem:[#allocation8 + $0xf0] sm:$0xf0]  ;;  %v2666_v25 = vor.u32 %v3828_v5, %v2663_v6 }
  0x24   :  { %v2784_v12 = vor.u32 %v3860_v8, %v2783_v7  ;;  %v3892_v13 = vld [vmem:[#allocation8 + $0x1ec] sm:$0xf0]  ;;  %v3890_v17 = vld [vmem:[#allocation8 + $0x1e4] sm:$0xf]  ;;  %v2913_v18 = vld [vmem:[#allocation8 + $0x1f0] sm:$0xf0]  ;;  %v2788_v29 = vor.u32 %v3858_v14, %v2785_v15 }
  0x25   :  { %v2912_v16 = vor.u32 %v3892_v13, %v2911_v9  ;;  %v2767_v19 = vld [vmem:[#allocation8 + $0xc0] sm:$0xf]  ;;  %v161_v20 = vsel %vm159_vm0, %v151_v10, 0  ;;  %v164_v21 = vsel %vm159_vm0, %v152_v11, 0  ;;  %v3856_v22 = vld [vmem:[#allocation8 + $0xcc] sm:$0xf0]  ;;  %v2916_v30 = vor.u32 %v3890_v17, %v2913_v18 }
  0x26   :  { %590 = vmatpush.bf16.msra.mxu2 %v2784_v12  ;;  %v2895_v23 = vld [vmem:[#allocation8 + $0x1c0] sm:$0xf]  ;;  %172 = vmatpush.bf16.msra.mxu0 %v161_v20  ;;  %v2768_v27 = vor.u32 %v3856_v22, %v2767_v19  ;;  %v3888_v28 = vld [vmem:[#allocation8 + $0x1cc] sm:$0xf0]  ;;  %v3854_v31 = vld [vmem:[#allocation8 + $0xc4] sm:$0xf] }
  0x27   :  { %185 = vmatpush.bf16.msra.mxu1 %v164_v21  ;;  %603 = vmatpush.bf16.msra.mxu3 %v2912_v16  ;;  %v2769_v32 = vld [vmem:[#allocation8 + $0xd0] sm:$0xf0]  ;;  %v2751_v33 = vld [vmem:[#allocation8 + $0xa0] sm:$0xf]  ;;  %v2896_v34 = vor.u32 %v3888_v28, %v2895_v23  ;;  %v3886_v35 = vld [vmem:[#allocation8 + $0x1c4] sm:$0xf] }
  0x28   :  { %v2897_v36 = vld [vmem:[#allocation8 + $0x1d0] sm:$0xf0]  ;;  %v3852_v37 = vld [vmem:[#allocation8 + $0xac] sm:$0xf0]  ;;  %v2879_v39 = vld [vmem:[#allocation8 + $0x1a0] sm:$0xf]  ;;  %v2772_v42 = vor.u32 %v3854_v31, %v2769_v32 }
  0x29   :  { %v3884_v40 = vld [vmem:[#allocation8 + $0x1ac] sm:$0xf0]  ;;  %vm155_vm1 = vcmask 162816   ;;  %v2752_v41 = vor.u32 %v3852_v37, %v2751_v33  ;;  %v2900_v43 = vor.u32 %v3886_v35, %v2897_v36  ;;  %v3850_v44 = vld [vmem:[#allocation8 + $0xa4] sm:$0xf]  ;;  %s4375_s4 = smov [#allocation14]  }
  0x2a   :  { %591 = vmatpush.bf16.msra.mxu2 %v2768_v27  ;;  %173 = vmatpush.bf16.msra.mxu0 %v2662_v24  ;;  %v2735_v45 = vld [vmem:[#allocation8 + $0x80] sm:$0xf]  ;;  %v3848_v46 = vld [vmem:[#allocation8 + $0x8c] sm:$0xf0]  ;;  %v2880_v47 = vor.u32 %v3884_v40, %v2879_v39  ;;  %v2753_v48 = vld [vmem:[#allocation8 + $0xb0] sm:$0xf0] }
  0x2b   :  { %186 = vmatpush.bf16.msra.mxu1 %v2666_v25  ;;  %604 = vmatpush.bf16.msra.mxu3 %v2896_v34  ;;  %v3882_v49 = vld [vmem:[#allocation8 + $0x1a4] sm:$0xf]  ;;  %v2881_v50 = vld [vmem:[#allocation8 + $0x1b0] sm:$0xf0]  ;;  %v2863_v51 = vld [vmem:[#allocation8 + $0x180] sm:$0xf]  ;;  %v2736_v53 = vor.u32 %v3848_v46, %v2735_v45  ;;  %v2756_v54 = vor.u32 %v3850_v44, %v2753_v48 }
  0x2c   :  { %v3880_v52 = vld [vmem:[#allocation8 + $0x18c] sm:$0xf0]  ;;  %v2884_v55 = vor.u32 %v3882_v49, %v2881_v50  ;;  %v3846_v56 = vld [vmem:[#allocation8 + $0x84] sm:$0xf]  ;;  %v2719_v57 = vld [vmem:[#allocation8 + $0x60] sm:$0xf] }
  0x2d   :  { %2667 = vmatmul.msk.bf16.vlgmr.msra.gmra.mxu0 %vm155_vm1, %v130_v38  ;;  %v3844_v58 = vld [vmem:[#allocation8 + $0x6c] sm:$0xf0]  ;;  %v2864_v59 = vor.u32 %v3880_v52, %v2863_v51  ;;  %v2737_v60 = vld [vmem:[#allocation8 + $0x90] sm:$0xf0]  ;;  %v3878_v61 = vld [vmem:[#allocation8 + $0x184] sm:$0xf] }
  0x2e   :  { %616 = vmatpush.bf16.msrb.mxu0 %v2788_v29  ;;  %2668 = vmatmul.msk.bf16.vlgmr.msra.gmra.mxu1 %vm155_vm1, %v130_v38  ;;  %v2865_v62 = vld [vmem:[#allocation8 + $0x190] sm:$0xf0]  ;;  %v2847_v63 = vld [vmem:[#allocation8 + $0x160] sm:$0xf]  ;;  %v3876_v0 = vld [vmem:[#allocation8 + $0x16c] sm:$0xf0]  ;;  %v2720_v1 = vor.u32 %v3844_v58, %v2719_v57  ;;  %v2740_v2 = vor.u32 %v3846_v56, %v2737_v60 }
  0x2f   :  { %629 = vmatpush.bf16.msrb.mxu1 %v2916_v30  ;;  %592 = vmatpush.bf16.msra.mxu2 %v2752_v41  ;;  %v2868_v3 = vor.u32 %v3878_v61, %v2865_v62  ;;  %v3842_v4 = vld [vmem:[#allocation8 + $0x64] sm:$0xf]  ;;  %v2703_v5 = vld [vmem:[#allocation8 + $0x40] sm:$0xf]  ;;  %v3840_v6 = vld [vmem:[#allocation8 + $0x4c] sm:$0xf0]  ;;  %v2848_v7 = vor.u32 %v3876_v0, %v2847_v63 }
  0x30   :  { %605 = vmatpush.bf16.msra.mxu3 %v2880_v47  ;;  %v2721_v8 = vld [vmem:[#allocation8 + $0x70] sm:$0xf0]  ;;  %v3874_v9 = vld [vmem:[#allocation8 + $0x164] sm:$0xf]  ;;  %v2831_v11 = vld [vmem:[#allocation8 + $0x140] sm:$0xf]  ;;  %v2704_v13 = vor.u32 %v3840_v6, %v2703_v5 }
  0x31   :  { %v2849_v10 = vld [vmem:[#allocation8 + $0x170] sm:$0xf0]  ;;  %v3872_v12 = vld [vmem:[#allocation8 + $0x14c] sm:$0xf0]  ;;  %v2724_v14 = vor.u32 %v3842_v4, %v2721_v8  ;;  %v3838_v16 = vld [vmem:[#allocation8 + $0x44] sm:$0xf] }
  0x32   :  { %617 = vmatpush.bf16.msrb.mxu0 %v2772_v42  ;;  %v2852_v15 = vor.u32 %v3874_v9, %v2849_v10  ;;  %v2687_v17 = vld [vmem:[#allocation8 + $0x20] sm:$0xf]  ;;  %v3836_v18 = vld [vmem:[#allocation8 + $0x2c] sm:$0xf0]  ;;  %v2832_v19 = vor.u32 %v3872_v12, %v2831_v11  ;;  %v2705_v20 = vld [vmem:[#allocation8 + $0x50] sm:$0xf0] }
  0x33   :  { %630 = vmatpush.bf16.msrb.mxu1 %v2900_v43  ;;  %593 = vmatpush.bf16.msra.mxu2 %v2736_v53  ;;  %v3870_v21 = vld [vmem:[#allocation8 + $0x144] sm:$0xf]  ;;  %v2833_v22 = vld [vmem:[#allocation8 + $0x150] sm:$0xf0]  ;;  %v2815_v23 = vld [vmem:[#allocation8 + $0x120] sm:$0xf]  ;;  %v2688_v25 = vor.u32 %v3836_v18, %v2687_v17  ;;  %v2708_v27 = vor.u32 %v3838_v16, %v2705_v20 }
  0x34   :  { %606 = vmatpush.bf16.msra.mxu3 %v2864_v59  ;;  %v3868_v24 = vld [vmem:[#allocation8 + $0x12c] sm:$0xf0]  ;;  %v3834_v26 = vld [vmem:[#allocation8 + $0x24] sm:$0xf]  ;;  %v2836_v28 = vor.u32 %v3870_v21, %v2833_v22  ;;  %v2689_v29 = vld [vmem:[#allocation8 + $0x30] sm:$0xf0] }
  0x35   :  { %v2671_v30 = vld [vmem:[#allocation8] sm:$0xf]  ;;  %v3832_v31 = vld [vmem:[#allocation8 + $0xc] sm:$0xf0]  ;;  %v2816_v32 = vor.u32 %v3868_v24, %v2815_v23  ;;  %v3866_v33 = vld [vmem:[#allocation8 + $0x124] sm:$0xf]  ;;  %v2692_v42 = vor.u32 %v3834_v26, %v2689_v29 }
  0x36   :  { %618 = vmatpush.bf16.msrb.mxu0 %v2756_v54  ;;  %v2817_v34 = vld [vmem:[#allocation8 + $0x130] sm:$0xf0]  ;;  %v2799_v35 = vld [vmem:[#allocation8 + $0x100] sm:$0xf]  ;;  %v3864_v36 = vld [vmem:[#allocation8 + $0x10c] sm:$0xf0]  ;;  %v2672_v39 = vor.u32 %v3832_v31, %v2671_v30 }
  0x37   :  { %631 = vmatpush.bf16.msrb.mxu1 %v2884_v55  ;;  %594 = vmatpush.bf16.msra.mxu2 %v2720_v1  ;;  %v2791_v37 = vld [vmem:[#allocation8 + $0xe8] sm:$0xf]  ;;  %v3861_v38 = vld [vmem:[#allocation8 + $0xf4] sm:$0xf0]  ;;  %v2820_v43 = vor.u32 %v3866_v33, %v2817_v34  ;;  %v3830_v44 = vld [vmem:[#allocation8 + $0x4] sm:$0xf]  ;;  %v2800_v47 = vor.u32 %v3864_v36, %v2799_v35 }
  0x38   :  { %607 = vmatpush.bf16.msra.mxu3 %v2848_v7  ;;  %v2919_v40 = vld [vmem:[#allocation8 + $0x1e8] sm:$0xf]  ;;  %v3893_v41 = vld [vmem:[#allocation8 + $0x1f4] sm:$0xf0]  ;;  %v2673_v45 = vld [vmem:[#allocation8 + $0x10] sm:$0xf0]  ;;  %v2792_v49 = vor.u32 %v3861_v38, %v2791_v37 }
  0x39   :  { %v3862_v46 = vld [vmem:[#allocation8 + $0x104] sm:$0xf]  ;;  %v2801_v48 = vld [vmem:[#allocation8 + $0x110] sm:$0xf0]  ;;  %v3859_v50 = vld [vmem:[#allocation8 + $0xec] sm:$0xf]  ;;  %v2920_v52 = vor.u32 %v3893_v41, %v2919_v40  ;;  %v2676_v59 = vor.u32 %v3830_v44, %v2673_v45 }
  0x3a   :  { %619 = vmatpush.bf16.msrb.mxu0 %v2740_v2  ;;  %v2793_v51 = vld [vmem:[#allocation8 + $0xf8] sm:$0xf0]  ;;  %v3891_v53 = vld [vmem:[#allocation8 + $0x1ec] sm:$0xf]  ;;  %v2775_v55 = vld [vmem:[#allocation8 + $0xc8] sm:$0xf]  ;;  %v2804_v60 = vor.u32 %v3862_v46, %v2801_v48 }
  0x3b   :  { %632 = vmatpush.bf16.msrb.mxu1 %v2868_v3  ;;  %595 = vmatpush.bf16.msra.mxu2 %v2704_v13  ;;  %v2921_v54 = vld [vmem:[#allocation8 + $0x1f8] sm:$0xf0]  ;;  %v3857_v56 = vld [vmem:[#allocation8 + $0xd4] sm:$0xf0]  ;;  %v2903_v57 = vld [vmem:[#allocation8 + $0x1c8] sm:$0xf]  ;;  %v2796_v61 = vor.u32 %v3859_v50, %v2793_v51 }
  0x3c   :  { %608 = vmatpush.bf16.msra.mxu3 %v2832_v19  ;;  %v3889_v58 = vld [vmem:[#allocation8 + $0x1d4] sm:$0xf0]  ;;  %v2924_v62 = vor.u32 %v3891_v53, %v2921_v54  ;;  %v3855_v63 = vld [vmem:[#allocation8 + $0xcc] sm:$0xf]  ;;  %v2776_v0 = vor.u32 %v3857_v56, %v2775_v55  ;;  %v2777_v2 = vld [vmem:[#allocation8 + $0xd8] sm:$0xf0] }
  0x3d   :  { %v2904_v1 = vor.u32 %v3889_v58, %v2903_v57  ;;  %v3887_v3 = vld [vmem:[#allocation8 + $0x1cc] sm:$0xf]  ;;  %v2905_v4 = vld [vmem:[#allocation8 + $0x1d8] sm:$0xf0]  ;;  %v2780_v5 = vor.u32 %v3855_v63, %v2777_v2  ;;  %v2759_v7 = vld [vmem:[#allocation8 + $0xa8] sm:$0xf] }
  0x3e   :  { %620 = vmatpush.bf16.msrb.mxu0 %v2724_v14  ;;  %v2908_v6 = vor.u32 %v3887_v3, %v2905_v4  ;;  %v3853_v8 = vld [vmem:[#allocation8 + $0xb4] sm:$0xf0]  ;;  %v2887_v9 = vld [vmem:[#allocation8 + $0x1a8] sm:$0xf]  ;;  %v3851_v12 = vld [vmem:[#allocation8 + $0xac] sm:$0xf] }
  0x3f   :  { %633 = vmatpush.bf16.msrb.mxu1 %v2852_v15  ;;  %596 = vmatpush.bf16.msra.mxu2 %v2688_v25  ;;  %v2760_v10 = vor.u32 %v3853_v8, %v2759_v7  ;;  %v3885_v11 = vld [vmem:[#allocation8 + $0x1b4] sm:$0xf0]  ;;  %v2761_v13 = vld [vmem:[#allocation8 + $0xb8] sm:$0xf0]  ;;  %v3883_v16 = vld [vmem:[#allocation8 + $0x1ac] sm:$0xf] }
  0x40   :  { %609 = vmatpush.bf16.msra.mxu3 %v2816_v32  ;;  %v2888_v14 = vor.u32 %v3885_v11, %v2887_v9  ;;  %v2764_v15 = vor.u32 %v3851_v12, %v2761_v13  ;;  %v2889_v17 = vld [vmem:[#allocation8 + $0x1b8] sm:$0xf0]  ;;  %v2743_v19 = vld [vmem:[#allocation8 + $0x88] sm:$0xf]  ;;  %v3849_v20 = vld [vmem:[#allocation8 + $0x94] sm:$0xf0] }
  0x41   :  { %v2892_v18 = vor.u32 %v3883_v16, %v2889_v17  ;;  %v2871_v21 = vld [vmem:[#allocation8 + $0x188] sm:$0xf]  ;;  %v2744_v22 = vor.u32 %v3849_v20, %v2743_v19  ;;  %v3881_v23 = vld [vmem:[#allocation8 + $0x194] sm:$0xf0]  ;;  %v3847_v24 = vld [vmem:[#allocation8 + $0x8c] sm:$0xf] }
  0x42   :  { %621 = vmatpush.bf16.msrb.mxu0 %v2708_v27  ;;  %v2745_v25 = vld [vmem:[#allocation8 + $0x98] sm:$0xf0]  ;;  %v2872_v26 = vor.u32 %v3881_v23, %v2871_v21  ;;  %v2727_v31 = vld [vmem:[#allocation8 + $0x68] sm:$0xf]  ;;  %v3845_v32 = vld [vmem:[#allocation8 + $0x74] sm:$0xf0] }
  0x43   :  { %634 = vmatpush.bf16.msrb.mxu1 %v2836_v28  ;;  %597 = vmatpush.bf16.msra.mxu2 %v2672_v39  ;;  %v2748_v27 = vor.u32 %v3847_v24, %v2745_v25  ;;  %v3879_v28 = vld [vmem:[#allocation8 + $0x18c] sm:$0xf]  ;;  %v2873_v29 = vld [vmem:[#allocation8 + $0x198] sm:$0xf0]  ;;  %v2855_v33 = vld [vmem:[#allocation8 + $0x168] sm:$0xf]  ;;  %v2728_v34 = vor.u32 %v3845_v32, %v2727_v31 }
  0x44   :  { %610 = vmatpush.bf16.msra.mxu3 %v2800_v47  ;;  %v2876_v30 = vor.u32 %v3879_v28, %v2873_v29  ;;  %v3877_v35 = vld [vmem:[#allocation8 + $0x174] sm:$0xf0]  ;;  %v3843_v36 = vld [vmem:[#allocation8 + $0x6c] sm:$0xf]  ;;  %v2729_v37 = vld [vmem:[#allocation8 + $0x78] sm:$0xf0] }
  0x45   :  { %v2856_v38 = vor.u32 %v3877_v35, %v2855_v33  ;;  %v2732_v39 = vor.u32 %v3843_v36, %v2729_v37  ;;  %v3875_v40 = vld [vmem:[#allocation8 + $0x16c] sm:$0xf]  ;;  %v2857_v41 = vld [vmem:[#allocation8 + $0x178] sm:$0xf0]  ;;  %v3841_v44 = vld [vmem:[#allocation8 + $0x54] sm:$0xf0] }
  0x46   :  { %622 = vmatpush.bf16.msrb.mxu0 %v2692_v42  ;;  %v2711_v42 = vld [vmem:[#allocation8 + $0x48] sm:$0xf]  ;;  %v3873_v46 = vld [vmem:[#allocation8 + $0x154] sm:$0xf0]  ;;  %v2713_v50 = vld [vmem:[#allocation8 + $0x58] sm:$0xf0] }
  0x47   :  { %635 = vmatpush.bf16.msrb.mxu1 %v2820_v43  ;;  %642 = vmatpush.bf16.msrb.mxu2 %v2792_v49  ;;  %v2860_v43 = vor.u32 %v3875_v40, %v2857_v41  ;;  %v2839_v45 = vld [vmem:[#allocation8 + $0x148] sm:$0xf]  ;;  %v2712_v47 = vor.u32 %v3841_v44, %v2711_v42  ;;  %v3839_v49 = vld [vmem:[#allocation8 + $0x4c] sm:$0xf]  ;;  %v2841_v53 = vld [vmem:[#allocation8 + $0x158] sm:$0xf0] }
  0x48   :  { %655 = vmatpush.bf16.msrb.mxu3 %v2920_v52  ;;  %v2840_v48 = vor.u32 %v3873_v46, %v2839_v45  ;;  %v3871_v51 = vld [vmem:[#allocation8 + $0x14c] sm:$0xf]  ;;  %v2716_v52 = vor.u32 %v3839_v49, %v2713_v50  ;;  %v2695_v54 = vld [vmem:[#allocation8 + $0x28] sm:$0xf]  ;;  %v3837_v55 = vld [vmem:[#allocation8 + $0x34] sm:$0xf0] }
  0x49   :  { %v2844_v56 = vor.u32 %v3871_v51, %v2841_v53  ;;  %v2823_v57 = vld [vmem:[#allocation8 + $0x128] sm:$0xf]  ;;  %v3869_v58 = vld [vmem:[#allocation8 + $0x134] sm:$0xf0]  ;;  %v2825_v63 = vld [vmem:[#allocation8 + $0x138] sm:$0xf0] }
  0x4a   :  { %623 = vmatpush.bf16.msrb.mxu0 %v2676_v59  ;;  %v3835_v59 = vld [vmem:[#allocation8 + $0x2c] sm:$0xf]  ;;  %v2679_v2 = vld [vmem:[#allocation8 + $0x8] sm:$0xf]  ;;  %v3833_v3 = vld [vmem:[#allocation8 + $0x14] sm:$0xf0] }
  0x4b   :  { %636 = vmatpush.bf16.msrb.mxu1 %v2804_v60  ;;  %643 = vmatpush.bf16.msrb.mxu2 %v2776_v0  ;;  %v2696_v60 = vor.u32 %v3837_v55, %v2695_v54  ;;  %v2824_v0 = vor.u32 %v3869_v58, %v2823_v57  ;;  %v2807_v4 = vld [vmem:[#allocation8 + $0x108] sm:$0xf]  ;;  %v3831_v7 = vld [vmem:[#allocation8 + $0xc] sm:$0xf]  ;;  %v2681_v8 = vld [vmem:[#allocation8 + $0x18] sm:$0xf0]  ;;  %v2680_v11 = vor.u32 %v3833_v3, %v2679_v2 }
  0x4c   :  { %656 = vmatpush.bf16.msrb.mxu3 %v2904_v1  ;;  %v3863_v9 = vld [vmem:[#allocation8 + $0x10c] sm:$0xf]  ;;  %v2684_v13 = vor.u32 %v3831_v7, %v2681_v8  ;;  %v4002_v23 = vld [vmem:[#allocation11 + $0x360] sm:$0xf0]  ;;  %v3319_v35 = vld [vmem:[#allocation11 + $0x310] sm:$0xf] }
  0x4d   :  { %v3123_v24 = vld [vmem:[#allocation11 + $0x188] sm:$0xf]  ;;  %v3946_v25 = vld [vmem:[#allocation11 + $0x1a0] sm:$0xf0]  ;;  %v3995_v36 = vld [vmem:[#allocation11 + $0x328] sm:$0xf0] }
  0x4e   :  { %668 = vmatpush.bf16.msra.mxu0 %v2796_v61  ;;  %v2697_v61 = vld [vmem:[#allocation8 + $0x38] sm:$0xf0]  ;;  %v4058_v31 = vld [vmem:[#allocation11 + $0x520] sm:$0xf0]  ;;  %v3124_v37 = vor.u32 %v3946_v25, %v3123_v24  ;;  %v3767_v41 = vld [vmem:[#allocation11 + $0x690] sm:$0xf] }
  0x4f   :  { %681 = vmatpush.bf16.msra.mxu1 %v2924_v62  ;;  %644 = vmatpush.bf16.msrb.mxu2 %v2760_v10  ;;  %v3867_v62 = vld [vmem:[#allocation8 + $0x12c] sm:$0xf]  ;;  %v2700_v1 = vor.u32 %v3835_v59, %v2697_v61  ;;  %v2809_v10 = vld [vmem:[#allocation8 + $0x118] sm:$0xf0]  ;;  %v3543_v44 = vld [vmem:[#allocation11 + $0x4d0] sm:$0xf] }
  0x50   :  { %657 = vmatpush.bf16.msrb.mxu3 %v2888_v14  ;;  %v2812_v14 = vor.u32 %v3863_v9, %v2809_v10  ;;  %v4051_v45 = vld [vmem:[#allocation11 + $0x4e8] sm:$0xf0]  ;;  %v3291_v49 = vld [vmem:[#allocation11 + $0x2d8] sm:$0xf]  ;;  %v3988_v50 = vld [vmem:[#allocation11 + $0x2f0] sm:$0xf0] }
  0x51   :  { %v3932_v53 = vld [vmem:[#allocation11 + $0x130] sm:$0xf0]  ;;  %v3739_v55 = vld [vmem:[#allocation11 + $0x658] sm:$0xf]  ;;  %v3263_v61 = vld [vmem:[#allocation11 + $0x2a0] sm:$0xf] }
  0x52   :  { %669 = vmatpush.bf16.msra.mxu0 %v2780_v5  ;;  %v2828_v5 = vor.u32 %v3867_v62, %v2825_v63  ;;  %v4100_v57 = vld [vmem:[#allocation11 + $0x670] sm:$0xf0]  ;;  %v3515_v58 = vld [vmem:[#allocation11 + $0x498] sm:$0xf]  ;;  %v3981_v62 = vld [vmem:[#allocation11 + $0x2b8] sm:$0xf0] }
  0x53   :  { %682 = vmatpush.bf16.msra.mxu1 %v2908_v6  ;;  %645 = vmatpush.bf16.msrb.mxu2 %v2744_v22  ;;  %v3865_v6 = vld [vmem:[#allocation8 + $0x114] sm:$0xf0]  ;;  %v3347_v22 = vld [vmem:[#allocation11 + $0x348] sm:$0xf]  ;;  %v3740_v2 = vor.u32 %v4100_v57, %v3739_v55  ;;  %v3711_v3 = vld [vmem:[#allocation11 + $0x620] sm:$0xf]  ;;  %v3264_v8 = vor.u32 %v3981_v62, %v3263_v61 }
  0x54   :  { %658 = vmatpush.bf16.msrb.mxu3 %v2872_v26  ;;  %v2808_v12 = vor.u32 %v3865_v6, %v2807_v4  ;;  %v3795_v26 = vld [vmem:[#allocation11 + $0x6c8] sm:$0xf]  ;;  %v4044_v59 = vld [vmem:[#allocation11 + $0x4b0] sm:$0xf0]  ;;  %v3487_v6 = vld [vmem:[#allocation11 + $0x460] sm:$0xf] }
  0x55   :  { %v3516_v4 = vor.u32 %v4044_v59, %v3515_v58  ;;  %v4037_v7 = vld [vmem:[#allocation11 + $0x478] sm:$0xf0]  ;;  %v3235_v9 = vld [vmem:[#allocation11 + $0x268] sm:$0xf]  ;;  %v3974_v10 = vld [vmem:[#allocation11 + $0x280] sm:$0xf0] }
  0x56   :  { %670 = vmatpush.bf16.msra.mxu0 %v2764_v15  ;;  %v134_v15 = vld [vmem:[#allocation7] sm:$0x3]  ;;  %v2983_v24 = vld [vmem:[#allocation11 + $0x70] sm:$0xf]  ;;  %v3911_v25 = vld [vmem:[#allocation11 + $0x88] sm:$0xf0] }
  0x57   :  { %683 = vmatpush.bf16.msra.mxu1 %v2892_v18  ;;  %646 = vmatpush.bf16.msrb.mxu2 %v2728_v34  ;;  %v136_v16 = vperm.slane %v134_v15, 0  ;;  %v137_v17 = vperm.slane %v134_v15, 1  ;;  %v3348_v34 = vor.u32 %v4002_v23, %v3347_v22  ;;  %v3683_v15 = vld [vmem:[#allocation11 + $0x5e8] sm:$0xf]  ;;  %v3967_v22 = vld [vmem:[#allocation11 + $0x248] sm:$0xf0] }
  0x58   :  { %659 = vmatpush.bf16.msrb.mxu3 %v2856_v38  ;;  %v3095_v38 = vld [vmem:[#allocation11 + $0x150] sm:$0xf]  ;;  %v3125_v55 = vld [vmem:[#allocation11 + $0x1a4] sm:$0xf0]  ;;  %v4065_v57 = vld [vmem:[#allocation11 + $0x558] sm:$0xf0] }
  0x59   :  { %v3797_v61 = vld [vmem:[#allocation11 + $0x6e4] sm:$0xf0]  ;;  %s2644_s6 = sshll.u32 %s4375_s4, 4  ;;  %s2646_s15 = sshll.u32 %s4515_s7, 4  ;;  %s2645_s6 = int_to_ptr.vmem [resolvable:$true] %s2644_s6  ;;  %s2647_s15 = int_to_ptr.hbm [resolvable:$true] %s2646_s15 }
  0x5a   :  { %671 = vmatpush.bf16.msra.mxu0 %v2748_v27  ;;  %v4114_v27 = vld [vmem:[#allocation11 + $0x6e0] sm:$0xf0] }
  0x5b   :  { %684 = vmatpush.bf16.msra.mxu1 %v2876_v30  ;;  %647 = vmatpush.bf16.msrb.mxu2 %v2712_v47  ;;  %v3571_v30 = vld [vmem:[#allocation11 + $0x508] sm:$0xf]  ;;  %v3796_v40 = vor.u32 %v4114_v27, %v3795_v26  ;;  %v3655_v27 = vld [vmem:[#allocation11 + $0x5b0] sm:$0xf] }
  0x5c   :  { %660 = vmatpush.bf16.msrb.mxu3 %v2840_v48  ;;  %v3572_v42 = vor.u32 %v4058_v31, %v3571_v30  ;;  %v3320_v48 = vor.u32 %v3995_v36, %v3319_v35  ;;  %v3431_v30 = vld [vmem:[#allocation11 + $0x3f0] sm:$0xf]  ;;  %v4023_v31 = vld [vmem:[#allocation11 + $0x408] sm:$0xf0]  ;;  %v3179_v35 = vld [vmem:[#allocation11 + $0x1f8] sm:$0xf] }
  0x5d   :  { %v3960_v36 = vld [vmem:[#allocation11 + $0x210] sm:$0xf0] }
  0x5e   :  { %672 = vmatpush.bf16.msra.mxu0 %v2732_v39  ;;  %v3939_v39 = vld [vmem:[#allocation11 + $0x168] sm:$0xf0] }
  0x5f   :  { %685 = vmatpush.bf16.msra.mxu1 %v2860_v43  ;;  %648 = vmatpush.bf16.msrb.mxu2 %v2696_v60  ;;  %v4107_v43 = vld [vmem:[#allocation11 + $0x6a8] sm:$0xf0]  ;;  %v3096_v51 = vor.u32 %v3939_v39, %v3095_v38  ;;  %v3292_v60 = vor.u32 %v3988_v50, %v3291_v49  ;;  %v2955_v38 = vld [vmem:[#allocation11 + $0x38] sm:$0xf]  ;;  %v3904_v39 = vld [vmem:[#allocation11 + $0x50] sm:$0xf0] }
  0x60   :  { %661 = vmatpush.bf16.msrb.mxu3 %v2824_v0  ;;  %v3768_v54 = vor.u32 %v4107_v43, %v3767_v41  ;;  %v3039_v0 = vld [vmem:[#allocation11 + $0xe0] sm:$0xf]  ;;  %v3627_v41 = vld [vmem:[#allocation11 + $0x578] sm:$0xf]  ;;  %v4072_v43 = vld [vmem:[#allocation11 + $0x590] sm:$0xf0] }
  0x61   :  { %v2927_v49 = vld [vmem:[#allocation11] sm:$0xf]  ;;  %v3897_v50 = vld [vmem:[#allocation11 + $0x18] sm:$0xf0] }
  0x62   :  { %673 = vmatpush.bf16.msra.mxu0 %v2716_v52  ;;  %v3067_v52 = vld [vmem:[#allocation11 + $0x118] sm:$0xf]  ;;  %v2928_v59 = vor.u32 %v3897_v50, %v2927_v49  ;;  %v3950_v50 = vld [vmem:[#allocation11 + $0x1c4] sm:$0xf] }
  0x63   :  { %686 = vmatpush.bf16.msra.mxu1 %v2844_v56  ;;  %649 = vmatpush.bf16.msrb.mxu2 %v2680_v11  ;;  %v3544_v56 = vor.u32 %v4051_v45, %v3543_v44  ;;  %v3068_v63 = vor.u32 %v3932_v53, %v3067_v52  ;;  %v3403_v44 = vld [vmem:[#allocation11 + $0x3b8] sm:$0xf]  ;;  %v4016_v45 = vld [vmem:[#allocation11 + $0x3d0] sm:$0xf0]  ;;  %v3349_v53 = vld [vmem:[#allocation11 + $0x364] sm:$0xf0] }
  0x64   :  { %662 = vmatpush.bf16.msrb.mxu3 %v2808_v12  ;;  %v3011_v12 = vld [vmem:[#allocation11 + $0xa8] sm:$0xf]  ;;  %v3404_v52 = vor.u32 %v4016_v45, %v3403_v44  ;;  %v3741_v44 = vld [vmem:[#allocation11 + $0x674] sm:$0xf0] }
  0x66   :  { %674 = vmatpush.bf16.msra.mxu0 %v2700_v1  ;;  %v3925_v1 = vld [vmem:[#allocation11 + $0xf8] sm:$0xf0] }
  0x67   :  { %687 = vmatpush.bf16.msra.mxu1 %v2828_v5  ;;  %v4093_v5 = vld [vmem:[#allocation11 + $0x638] sm:$0xf0]  ;;  %v3040_v11 = vor.u32 %v3925_v1, %v3039_v0  ;;  %v3321_v1 = vld [vmem:[#allocation11 + $0x32c] sm:$0xf0] }
  0x6a   :  { %675 = vmatpush.bf16.msra.mxu0 %v2684_v13  ;;  %v3918_v13 = vld [vmem:[#allocation11 + $0xc0] sm:$0xf0] }
  0x6b   :  { %688 = vmatpush.bf16.msra.mxu1 %v2812_v14  ;;  %v3712_v14 = vor.u32 %v4093_v5, %v3711_v3  ;;  %v3012_v23 = vor.u32 %v3918_v13, %v3011_v12  ;;  %v3097_v3 = vld [vmem:[#allocation11 + $0x16c] sm:$0xf0]  ;;  %v3978_v13 = vld [vmem:[#allocation11 + $0x2a4] sm:$0xf] }
  0xaa   :  { %v175_v18 = vpop.f32.mrf.mxu0 }
  0xab   :  { %v188_v19 = vpop.f32.mrf.mxu1  ;;  %v176_v20 = vadd.f32 %v175_v18, %v136_v16  ;;  %v3488_v16 = vor.u32 %v4037_v7, %v3487_v6  ;;  %v3459_v18 = vld [vmem:[#allocation11 + $0x428] sm:$0xf]  ;;  %v3985_v7 = vld [vmem:[#allocation11 + $0x2dc] sm:$0xf] }
  0xac   :  { %v189_v21 = vadd.f32 %v188_v19, %v137_v17  ;;  %v4086_v17 = vld [vmem:[#allocation11 + $0x600] sm:$0xf0] }
  0xad   :  { %v192_v28 = vmax.f32 %v176_v20, 0.0  ;;  %v4030_v19 = vld [vmem:[#allocation11 + $0x440] sm:$0xf0]  ;;  %v3236_v20 = vor.u32 %v3974_v10, %v3235_v9  ;;  %v3684_v26 = vor.u32 %v4086_v17, %v3683_v15  ;;  %v3293_v9 = vld [vmem:[#allocation11 + $0x2f4] sm:$0xf0] }
  0xae   :  { %v193_v29 = vmax.f32 %v189_v21, 0.0  ;;  %v3207_v21 = vld [vmem:[#allocation11 + $0x230] sm:$0xf]  ;;  %v3929_v10 = vld [vmem:[#allocation11 + $0x11c] sm:$0xf]  ;;  %v3296_v12 = vor.u32 %v3985_v7, %v3293_v9 }
  0xaf   :  { %v4439_v32 = vpack.c.bf16 %v192_v28, %v192_v28  ;;  %v3460_v28 = vor.u32 %v4030_v19, %v3459_v18  ;;  %v3265_v15 = vld [vmem:[#allocation11 + $0x2bc] sm:$0xf0]  ;;  %v4076_v7 = vld [vmem:[#allocation11 + $0x5b4] sm:$0xf] }
  0xb0   :  { %v4441_v33 = vpack.c.bf16 %v193_v29, %v193_v29  ;;  %v4079_v29 = vld [vmem:[#allocation11 + $0x5c8] sm:$0xf0]  ;;  %v3041_v17 = vld [vmem:[#allocation11 + $0xfc] sm:$0xf0]  ;;  %v3268_v18 = vor.u32 %v3978_v13, %v3265_v15  ;;  %v4069_v13 = vld [vmem:[#allocation11 + $0x57c] sm:$0xf] }
  0xb1   :  { %598 = vmatmul.bf16.vlgmr.msra.gmra.mxu2 %v4439_v32  ;;  %624 = vmatmul.bf16.vlgmr.msrb.gmra.mxu0 %v4439_v32 }
  0xb2   :  { %611 = vmatmul.bf16.vlgmr.msra.gmra.mxu3 %v4441_v33  ;;  %637 = vmatmul.bf16.vlgmr.msrb.gmra.mxu1 %v4441_v33  ;;  %v177_v46 = vpop.f32.mrf.mxu0 }
  0xb3   :  { %v190_v47 = vpop.f32.mrf.mxu1  ;;  %2123 = vmatpush.bf16.msra.mxu3 %v3348_v34  ;;  %2110 = vmatpush.bf16.msra.mxu2 %v3124_v37  ;;  %v3208_v34 = vor.u32 %v3967_v22, %v3207_v21  ;;  %v2984_v37 = vor.u32 %v3911_v25, %v2983_v24  ;;  %v3953_v46 = vld [vmem:[#allocation11 + $0x1d8] sm:$0xf0]  ;;  %v3237_v21 = vld [vmem:[#allocation11 + $0x284] sm:$0xf0]  ;;  %v3209_v24 = vld [vmem:[#allocation11 + $0x24c] sm:$0xf0] }
  0xb4   :  { %2149 = vmatpush.bf16.msrb.mxu1 %v3796_v40  ;;  %2136 = vmatpush.bf16.msrb.mxu0 %v3572_v42  ;;  %v3656_v40 = vor.u32 %v4079_v29, %v3655_v27  ;;  %v3432_v42 = vor.u32 %v4023_v31, %v3431_v30  ;;  %v2956_v47 = vor.u32 %v3904_v39, %v2955_v38  ;;  %v4104_v25 = vld [vmem:[#allocation11 + $0x694] sm:$0xf]  ;;  %v3769_v27 = vld [vmem:[#allocation11 + $0x6ac] sm:$0xf0]  ;;  %v4009_v29 = vld [vmem:[#allocation11 + $0x398] sm:$0xf0] }
  0xb5   :  { %v3772_v30 = vor.u32 %v4104_v25, %v3769_v27  ;;  %v3573_v38 = vld [vmem:[#allocation11 + $0x524] sm:$0xf0]  ;;  %v4451_v25 = vld [vmem:[#allocation10] sm:$0xf]  ;;  %v3377_v27 = vld [vmem:[#allocation11 + $0x39c] sm:$0xf0] }
  0xb7   :  { %2124 = vmatpush.bf16.msra.mxu3 %v3320_v48  ;;  %2111 = vmatpush.bf16.msra.mxu2 %v3096_v51  ;;  %v3999_v48 = vld [vmem:[#allocation11 + $0x34c] sm:$0xf]  ;;  %v3628_v51 = vor.u32 %v4072_v43, %v3627_v41  ;;  %v3181_v41 = vld [vmem:[#allocation11 + $0x214] sm:$0xf0] }
  0xb8   :  { %2150 = vmatpush.bf16.msrb.mxu1 %v3768_v54  ;;  %2137 = vmatpush.bf16.msrb.mxu0 %v3544_v56  ;;  %v3943_v54 = vld [vmem:[#allocation11 + $0x18c] sm:$0xf]  ;;  %v3599_v56 = vld [vmem:[#allocation11 + $0x540] sm:$0xf]  ;;  %v3352_v62 = vor.u32 %v3999_v48, %v3349_v53  ;;  %v3545_v48 = vld [vmem:[#allocation11 + $0x4ec] sm:$0xf0] }
  0xb9   :  { %v3128_v0 = vor.u32 %v3943_v54, %v3125_v55  ;;  %v4090_v53 = vld [vmem:[#allocation11 + $0x624] sm:$0xf]  ;;  %v3713_v54 = vld [vmem:[#allocation11 + $0x63c] sm:$0xf0] }
  0xba   :  { %v3716_v55 = vor.u32 %v4090_v53, %v3713_v54  ;;  %v3299_v53 = vld [vmem:[#allocation11 + $0x2e0] sm:$0xf]  ;;  %v3989_v54 = vld [vmem:[#allocation11 + $0x2f8] sm:$0xf0] }
  0xbb   :  { %2125 = vmatpush.bf16.msra.mxu3 %v3292_v60  ;;  %2112 = vmatpush.bf16.msra.mxu2 %v3068_v63  ;;  %v4111_v60 = vld [vmem:[#allocation11 + $0x6cc] sm:$0xf]  ;;  %v3992_v63 = vld [vmem:[#allocation11 + $0x314] sm:$0xf] }
  0xbc   :  { %2151 = vmatpush.bf16.msrb.mxu1 %v3740_v2  ;;  %2138 = vmatpush.bf16.msrb.mxu0 %v3516_v4  ;;  %v3936_v2 = vld [vmem:[#allocation11 + $0x154] sm:$0xf]  ;;  %v3600_v4 = vor.u32 %v4065_v57, %v3599_v56  ;;  %v3800_v5 = vor.u32 %v4111_v60, %v3797_v61  ;;  %v3324_v6 = vor.u32 %v3992_v63, %v3321_v1  ;;  %v3901_v56 = vld [vmem:[#allocation11 + $0x3c] sm:$0xf]  ;;  %v2957_v57 = vld [vmem:[#allocation11 + $0x54] sm:$0xf0] }
  0xbd   :  { %v3517_v60 = vld [vmem:[#allocation11 + $0x4b4] sm:$0xf0]  ;;  %v3685_v63 = vld [vmem:[#allocation11 + $0x604] sm:$0xf0]  ;;  %v3894_v1 = vld [vmem:[#allocation11 + $0x4] sm:$0xf] }
  0xbf   :  { %2126 = vmatpush.bf16.msra.mxu3 %v3264_v8  ;;  %2113 = vmatpush.bf16.msra.mxu2 %v3040_v11  ;;  %v3100_v8 = vor.u32 %v3936_v2, %v3097_v3  ;;  %v3069_v11 = vld [vmem:[#allocation11 + $0x134] sm:$0xf0]  ;;  %v2929_v2 = vld [vmem:[#allocation11 + $0x1c] sm:$0xf0]  ;;  %v4034_v3 = vld [vmem:[#allocation11 + $0x464] sm:$0xf] }
  0xc0   :  { %2152 = vmatpush.bf16.msrb.mxu1 %v3712_v14  ;;  %2139 = vmatpush.bf16.msrb.mxu0 %v3488_v16  ;;  %v3072_v14 = vor.u32 %v3929_v10, %v3069_v11  ;;  %v3922_v16 = vld [vmem:[#allocation11 + $0xe4] sm:$0xf]  ;;  %v4027_v10 = vld [vmem:[#allocation11 + $0x42c] sm:$0xf]  ;;  %v3461_v11 = vld [vmem:[#allocation11 + $0x444] sm:$0xf0] }
  0xc1   :  { %650 = vmatmul.bf16.vlgmr.msrb.gmra.mxu2 %v4439_v32  ;;  %676 = vmatmul.bf16.vlgmr.msra.gmra.mxu0 %v4439_v32  ;;  %v3180_v32 = vor.u32 %v3960_v36, %v3179_v35  ;;  %v3044_v19 = vor.u32 %v3922_v16, %v3041_v17  ;;  %v3013_v35 = vld [vmem:[#allocation11 + $0xc4] sm:$0xf0]  ;;  %v4055_v36 = vld [vmem:[#allocation11 + $0x50c] sm:$0xf]  ;;  %v4020_v16 = vld [vmem:[#allocation11 + $0x3f4] sm:$0xf] }
  0xc2   :  { %663 = vmatmul.bf16.vlgmr.msrb.gmra.mxu3 %v4441_v33  ;;  %689 = vmatmul.bf16.vlgmr.msra.gmra.mxu1 %v4441_v33  ;;  %v3151_v33 = vld [vmem:[#allocation11 + $0x1c0] sm:$0xf]  ;;  %v3576_v39 = vor.u32 %v4055_v36, %v3573_v38  ;;  %v3433_v17 = vld [vmem:[#allocation11 + $0x40c] sm:$0xf0]  ;;  %v4003_v38 = vld [vmem:[#allocation11 + $0x368] sm:$0xf0] }
  0xc3   :  { %2127 = vmatpush.bf16.msra.mxu3 %v3236_v20  ;;  %2114 = vmatpush.bf16.msra.mxu2 %v3012_v23  ;;  %v3152_v58 = vor.u32 %v3953_v46, %v3151_v33  ;;  %v3971_v20 = vld [vmem:[#allocation11 + $0x26c] sm:$0xf]  ;;  %v3964_v23 = vld [vmem:[#allocation11 + $0x234] sm:$0xf]  ;;  %v2985_v33 = vld [vmem:[#allocation11 + $0x8c] sm:$0xf0] }
  0xc4   :  { %2153 = vmatpush.bf16.msrb.mxu1 %v3684_v26  ;;  %2140 = vmatpush.bf16.msrb.mxu0 %v3460_v28  ;;  %v3240_v22 = vor.u32 %v3971_v20, %v3237_v21  ;;  %v3212_v26 = vor.u32 %v3964_v23, %v3209_v24  ;;  %v3375_v28 = vld [vmem:[#allocation11 + $0x380] sm:$0xf]  ;;  %v4048_v46 = vld [vmem:[#allocation11 + $0x4d4] sm:$0xf]  ;;  %v3405_v23 = vld [vmem:[#allocation11 + $0x3d4] sm:$0xf0] }
  0xc5   :  { %v3376_v31 = vor.u32 %v4009_v29, %v3375_v28  ;;  %v3548_v49 = vor.u32 %v4048_v46, %v3545_v48  ;;  %v3601_v20 = vld [vmem:[#allocation11 + $0x55c] sm:$0xf0]  ;;  %v263_v28 = vperm.slane %v4451_v25, 1  ;;  %v3131_v48 = vld [vmem:[#allocation11 + $0x190] sm:$0xf] }
  0xc7   :  { %2128 = vmatpush.bf16.msra.mxu3 %v3208_v34  ;;  %2115 = vmatpush.bf16.msra.mxu2 %v2984_v37  ;;  %v3915_v34 = vld [vmem:[#allocation11 + $0xac] sm:$0xf] }
  0xc8   :  { %2154 = vmatpush.bf16.msrb.mxu1 %v3656_v40  ;;  %2141 = vmatpush.bf16.msrb.mxu0 %v3432_v42  ;;  %v3016_v37 = vor.u32 %v3915_v34, %v3013_v35  ;;  %v3957_v40 = vld [vmem:[#allocation11 + $0x1fc] sm:$0xf]  ;;  %v262_v35 = vperm.slane %v4451_v25, 0 }
  0xc9   :  { %v4097_v42 = vld [vmem:[#allocation11 + $0x65c] sm:$0xf]  ;;  %v3184_v43 = vor.u32 %v3957_v40, %v3181_v41 }
  0xca   :  { %v3744_v45 = vor.u32 %v4097_v42, %v3741_v44 }
  0xcb   :  { %2129 = vmatpush.bf16.msra.mxu3 %v3180_v32  ;;  %2116 = vmatpush.bf16.msra.mxu2 %v2956_v47  ;;  %v3908_v32 = vld [vmem:[#allocation11 + $0x74] sm:$0xf] }
  0xcc   :  { %2155 = vmatpush.bf16.msrb.mxu1 %v3628_v51  ;;  %2142 = vmatpush.bf16.msrb.mxu0 %v3404_v52  ;;  %v2988_v47 = vor.u32 %v3908_v32, %v2985_v33  ;;  %v3153_v51 = vld [vmem:[#allocation11 + $0x1dc] sm:$0xf0]  ;;  %v3996_v32 = vld [vmem:[#allocation11 + $0x330] sm:$0xf0] }
  0xcd   :  { %v3156_v52 = vor.u32 %v3950_v50, %v3153_v51 }
  0xcf   :  { %2130 = vmatpush.bf16.msra.mxu3 %v3152_v58  ;;  %2117 = vmatpush.bf16.msra.mxu2 %v2928_v59  ;;  %v4041_v58 = vld [vmem:[#allocation11 + $0x49c] sm:$0xf]  ;;  %v2960_v59 = vor.u32 %v3901_v56, %v2957_v57  ;;  %v3103_v56 = vld [vmem:[#allocation11 + $0x158] sm:$0xf]  ;;  %v3940_v57 = vld [vmem:[#allocation11 + $0x170] sm:$0xf0] }
  0xd0   :  { %2156 = vmatpush.bf16.msrb.mxu1 %v3600_v4  ;;  %2143 = vmatpush.bf16.msrb.mxu0 %v3376_v31  ;;  %v3520_v61 = vor.u32 %v4041_v58, %v3517_v60  ;;  %v2932_v4 = vor.u32 %v3894_v1, %v2929_v2  ;;  %v265_v60 = vperm.slane %v4451_v25, 3 }
  0xd3   :  { %2175 = vmatpush.bf16.msrb.mxu3 %v3352_v62  ;;  %2162 = vmatpush.bf16.msrb.mxu2 %v3128_v0  ;;  %v4083_v62 = vld [vmem:[#allocation11 + $0x5ec] sm:$0xf] }
  0xd4   :  { %2201 = vmatpush.bf16.msra.mxu1 %v3800_v5  ;;  %2188 = vmatpush.bf16.msra.mxu0 %v3576_v39  ;;  %v3688_v0 = vor.u32 %v4083_v62, %v3685_v63  ;;  %v3489_v5 = vld [vmem:[#allocation11 + $0x47c] sm:$0xf0]  ;;  %v3104_v62 = vor.u32 %v3940_v57, %v3103_v56  ;;  %v3271_v63 = vld [vmem:[#allocation11 + $0x2a8] sm:$0xf]  ;;  %v3954_v56 = vld [vmem:[#allocation11 + $0x1e0] sm:$0xf0] }
  0xd5   :  { %v3719_v57 = vld [vmem:[#allocation11 + $0x628] sm:$0xf] }
  0xd7   :  { %2176 = vmatpush.bf16.msrb.mxu3 %v3324_v6  ;;  %2163 = vmatpush.bf16.msrb.mxu2 %v3100_v8  ;;  %v3492_v6 = vor.u32 %v4034_v3, %v3489_v5  ;;  %v3657_v8 = vld [vmem:[#allocation11 + $0x5cc] sm:$0xf0]  ;;  %v3075_v3 = vld [vmem:[#allocation11 + $0x120] sm:$0xf] }
  0xd8   :  { %2202 = vmatpush.bf16.msra.mxu1 %v3772_v30  ;;  %2189 = vmatpush.bf16.msra.mxu0 %v3548_v49  ;;  %v3660_v9 = vor.u32 %v4076_v7, %v3657_v8  ;;  %v3947_v49 = vld [vmem:[#allocation11 + $0x1a8] sm:$0xf0]  ;;  %v264_v7 = vperm.slane %v4451_v25, 2  ;;  %v3243_v8 = vld [vmem:[#allocation11 + $0x270] sm:$0xf] }
  0xd9   :  { %v3968_v25 = vld [vmem:[#allocation11 + $0x250] sm:$0xf0] }
  0xdb   :  { %2177 = vmatpush.bf16.msrb.mxu3 %v3296_v12  ;;  %2164 = vmatpush.bf16.msrb.mxu2 %v3072_v14  ;;  %v3464_v12 = vor.u32 %v4027_v10, %v3461_v11  ;;  %v3629_v14 = vld [vmem:[#allocation11 + $0x594] sm:$0xf0]  ;;  %v3975_v11 = vld [vmem:[#allocation11 + $0x288] sm:$0xf0] }
  0xdc   :  { %2203 = vmatpush.bf16.msra.mxu1 %v3744_v45  ;;  %2190 = vmatpush.bf16.msra.mxu0 %v3520_v61  ;;  %v3632_v15 = vor.u32 %v4069_v13, %v3629_v14  ;;  %v3327_v45 = vld [vmem:[#allocation11 + $0x318] sm:$0xf]  ;;  %v3300_v61 = vor.u32 %v3989_v54, %v3299_v53  ;;  %v4115_v13 = vld [vmem:[#allocation11 + $0x6e8] sm:$0xf0]  ;;  %v3047_v14 = vld [vmem:[#allocation11 + $0xe8] sm:$0xf] }
  0xdd   :  { %v3328_v51 = vor.u32 %v3996_v32, %v3327_v45  ;;  %v3159_v54 = vld [vmem:[#allocation11 + $0x1c8] sm:$0xf] }
  0xdf   :  { %2178 = vmatpush.bf16.msrb.mxu3 %v3268_v18  ;;  %2165 = vmatpush.bf16.msrb.mxu2 %v3044_v19  ;;  %v3436_v18 = vor.u32 %v4020_v16, %v3433_v17  ;;  %v4062_v19 = vld [vmem:[#allocation11 + $0x544] sm:$0xf] }
  0xe0   :  { %2204 = vmatpush.bf16.msra.mxu1 %v3716_v55  ;;  %2191 = vmatpush.bf16.msra.mxu0 %v3492_v6  ;;  %v3604_v21 = vor.u32 %v4062_v19, %v3601_v20  ;;  %v3244_v20 = vor.u32 %v3975_v11, %v3243_v8  ;;  %v3329_v11 = vld [vmem:[#allocation11 + $0x334] sm:$0xf0] }
  0xe3   :  { %2179 = vmatpush.bf16.msrb.mxu3 %v3240_v22  ;;  %2166 = vmatpush.bf16.msrb.mxu2 %v3016_v37  ;;  %v4013_v22 = vld [vmem:[#allocation11 + $0x3bc] sm:$0xf]  ;;  %v3355_v37 = vld [vmem:[#allocation11 + $0x350] sm:$0xf] }
  0xe4   :  { %2205 = vmatpush.bf16.msra.mxu1 %v3688_v0  ;;  %2192 = vmatpush.bf16.msra.mxu0 %v3464_v12  ;;  %v3408_v24 = vor.u32 %v4013_v22, %v3405_v23  ;;  %v3982_v0 = vld [vmem:[#allocation11 + $0x2c0] sm:$0xf0]  ;;  %v3803_v12 = vld [vmem:[#allocation11 + $0x6d0] sm:$0xf]  ;;  %v3215_v22 = vld [vmem:[#allocation11 + $0x238] sm:$0xf] }
  0xe5   :  { %v3272_v6 = vor.u32 %v3982_v0, %v3271_v63  ;;  %v2963_v63 = vld [vmem:[#allocation11 + $0x40] sm:$0xf]  ;;  %v3905_v0 = vld [vmem:[#allocation11 + $0x58] sm:$0xf0] }
  0xe6   :  { %v2964_v8 = vor.u32 %v3905_v0, %v2963_v63  ;;  %v3965_v0 = vld [vmem:[#allocation11 + $0x23c] sm:$0xf] }
  0xe7   :  { %2180 = vmatpush.bf16.msrb.mxu3 %v3212_v26  ;;  %2167 = vmatpush.bf16.msrb.mxu2 %v2988_v47  ;;  %v4006_v26 = vld [vmem:[#allocation11 + $0x384] sm:$0xf] }
  0xe8   :  { %2206 = vmatpush.bf16.msra.mxu1 %v3660_v9  ;;  %2193 = vmatpush.bf16.msra.mxu0 %v3436_v18  ;;  %v3380_v29 = vor.u32 %v4006_v26, %v3377_v27  ;;  %v3775_v26 = vld [vmem:[#allocation11 + $0x698] sm:$0xf]  ;;  %v4108_v27 = vld [vmem:[#allocation11 + $0x6b0] sm:$0xf0] }
  0xeb   :  { %2181 = vmatpush.bf16.msrb.mxu3 %v3184_v43  ;;  %2168 = vmatpush.bf16.msrb.mxu2 %v2960_v59  ;;  %v3356_v43 = vor.u32 %v4003_v38, %v3355_v37  ;;  %v3216_v38 = vor.u32 %v3968_v25, %v3215_v22  ;;  %v3986_v25 = vld [vmem:[#allocation11 + $0x2e4] sm:$0xf] }
  0xec   :  { %2207 = vmatpush.bf16.msra.mxu1 %v3632_v15  ;;  %2194 = vmatpush.bf16.msra.mxu0 %v3408_v24  ;;  %v3926_v15 = vld [vmem:[#allocation11 + $0x100] sm:$0xf0] }
  0xed   :  { %v3048_v24 = vor.u32 %v3926_v15, %v3047_v14  ;;  %v3495_v14 = vld [vmem:[#allocation11 + $0x468] sm:$0xf]  ;;  %v4038_v15 = vld [vmem:[#allocation11 + $0x480] sm:$0xf0] }
  0xef   :  { %2182 = vmatpush.bf16.msrb.mxu3 %v3156_v52  ;;  %2169 = vmatpush.bf16.msrb.mxu2 %v2932_v4  ;;  %v3132_v52 = vor.u32 %v3947_v49, %v3131_v48  ;;  %v3933_v4 = vld [vmem:[#allocation11 + $0x138] sm:$0xf0]  ;;  %v3912_v49 = vld [vmem:[#allocation11 + $0x90] sm:$0xf0] }
  0xf0   :  { %2208 = vmatpush.bf16.msra.mxu1 %v3604_v21  ;;  %2195 = vmatpush.bf16.msra.mxu0 %v3380_v29  ;;  %v3076_v10 = vor.u32 %v3933_v4, %v3075_v3  ;;  %v3804_v21 = vor.u32 %v4115_v13, %v3803_v12  ;;  %v3160_v3 = vor.u32 %v3954_v56, %v3159_v54  ;;  %v2935_v12 = vld [vmem:[#allocation11 + $0x8] sm:$0xf]  ;;  %v3898_v13 = vld [vmem:[#allocation11 + $0x20] sm:$0xf0]  ;;  %v3805_v54 = vld [vmem:[#allocation11 + $0x6ec] sm:$0xf0] }
  0xf1   :  { %v2936_v22 = vor.u32 %v3898_v13, %v2935_v12 }
 0x12e   :  { %v625_v30 = vpop.f32.mrf.mxu0 }
 0x12f   :  { %v638_v31 = vpop.f32.mrf.mxu1  ;;  %v626_v34 = vadd.f32 %v625_v30, %v263_v28 }
 0x131   :  { %v639_v36 = vadd.f32 %v638_v31, %v626_v34  ;;  %v3019_v31 = vld [vmem:[#allocation11 + $0xb0] sm:$0xf]  ;;  %v3919_v34 = vld [vmem:[#allocation11 + $0xc8] sm:$0xf0] }
 0x132   :  { %v3020_v32 = vor.u32 %v3919_v34, %v3019_v31  ;;  %v3937_v31 = vld [vmem:[#allocation11 + $0x15c] sm:$0xf]  ;;  %v3105_v34 = vld [vmem:[#allocation11 + $0x174] sm:$0xf0] }
 0x133   :  { %v695_v39 = vmax.f32 %v639_v36, 0.0  ;;  %v4059_v36 = vld [vmem:[#allocation11 + $0x528] sm:$0xf0] }
 0x134   :  { %v599_v40 = vpop.f32.mrf.mxu2 }
 0x135   :  { %v612_v41 = vpop.f32.mrf.mxu3  ;;  %v600_v42 = vadd.f32 %v599_v40, %v262_v35  ;;  %v4455_v44 = vpack.c.bf16 %v695_v39, %v695_v39  ;;  %v3579_v35 = vld [vmem:[#allocation11 + $0x510] sm:$0xf]  ;;  %v3776_v39 = vor.u32 %v4108_v27, %v3775_v26  ;;  %v3187_v40 = vld [vmem:[#allocation11 + $0x200] sm:$0xf] }
 0x136   :  { %v627_v46 = vpop.f32.mrf.mxu0  ;;  %v3301_v26 = vld [vmem:[#allocation11 + $0x2fc] sm:$0xf0] }
 0x137   :  { %v613_v33 = vadd.f32 %v612_v41, %v600_v42  ;;  %v640_v47 = vpop.f32.mrf.mxu1  ;;  %2131 = vmatmul.bf16.vlgmr.msra.gmra.mxu3 %v4455_v44  ;;  %v3961_v41 = vld [vmem:[#allocation11 + $0x218] sm:$0xf0]  ;;  %v3747_v42 = vld [vmem:[#allocation11 + $0x660] sm:$0xf]  ;;  %v2991_v46 = vld [vmem:[#allocation11 + $0x78] sm:$0xf] }
 0x138   :  { %2227 = vmatpush.bf16.msra.mxu3 %v3356_v43  ;;  %v4101_v43 = vld [vmem:[#allocation11 + $0x678] sm:$0xf0] }
 0x139   :  { %v694_v50 = vmax.f32 %v613_v33, 0.0  ;;  %v3580_v33 = vor.u32 %v4059_v36, %v3579_v35  ;;  %v3748_v53 = vor.u32 %v4101_v43, %v3747_v42  ;;  %v3304_v35 = vor.u32 %v3986_v25, %v3301_v26  ;;  %v3635_v36 = vld [vmem:[#allocation11 + $0x580] sm:$0xf]  ;;  %v3439_v42 = vld [vmem:[#allocation11 + $0x3f8] sm:$0xf] }
 0x13a   :  { %v4024_v43 = vld [vmem:[#allocation11 + $0x410] sm:$0xf0]  ;;  %v3553_v25 = vld [vmem:[#allocation11 + $0x4f4] sm:$0xf0] }
 0x13b   :  { %v4458_v55 = vpack.c.bf16 %v694_v50, %v694_v50  ;;  %v3551_v50 = vld [vmem:[#allocation11 + $0x4d8] sm:$0xf] }
 0x13c   :  { %v601_v58 = vpop.f32.mrf.mxu2  ;;  %2228 = vmatpush.bf16.msra.mxu3 %v3328_v51  ;;  %v4052_v51 = vld [vmem:[#allocation11 + $0x4f0] sm:$0xf0] }
 0x13d   :  { %v614_v59 = vpop.f32.mrf.mxu3  ;;  %2118 = vmatmul.bf16.vlgmr.msra.gmra.mxu2 %v4458_v55  ;;  %v4094_v58 = vld [vmem:[#allocation11 + $0x640] sm:$0xf0] }
 0x13e   :  { %2214 = vmatpush.bf16.msra.mxu2 %v3132_v52  ;;  %v677_v1 = vpop.f32.mrf.mxu0  ;;  %v3188_v52 = vor.u32 %v3961_v41, %v3187_v40  ;;  %v2992_v59 = vor.u32 %v3912_v49, %v2991_v46  ;;  %v3720_v4 = vor.u32 %v4094_v58, %v3719_v57  ;;  %v3273_v40 = vld [vmem:[#allocation11 + $0x2c4] sm:$0xf0]  ;;  %v3108_v41 = vor.u32 %v3937_v31, %v3105_v34  ;;  %v3077_v46 = vld [vmem:[#allocation11 + $0x13c] sm:$0xf0]  ;;  %v4066_v49 = vld [vmem:[#allocation11 + $0x560] sm:$0xf0] }
 0x13f   :  { %v690_v2 = vpop.f32.mrf.mxu1  ;;  %v678_v5 = vadd.f32 %v677_v1, %v265_v60  ;;  %v3552_v60 = vor.u32 %v4052_v51, %v3551_v50  ;;  %v3523_v1 = vld [vmem:[#allocation11 + $0x4a0] sm:$0xf]  ;;  %v3972_v50 = vld [vmem:[#allocation11 + $0x274] sm:$0xf]  ;;  %v3440_v51 = vor.u32 %v4024_v43, %v3439_v42  ;;  %v4017_v58 = vld [vmem:[#allocation11 + $0x3d8] sm:$0xf0] }
 0x140   :  { %2229 = vmatpush.bf16.msra.mxu3 %v3300_v61  ;;  %v4000_v61 = vld [vmem:[#allocation11 + $0x354] sm:$0xf]  ;;  %v3411_v57 = vld [vmem:[#allocation11 + $0x3c0] sm:$0xf]  ;;  %v3721_v31 = vld [vmem:[#allocation11 + $0x644] sm:$0xf0] }
 0x141   :  { %v691_v9 = vadd.f32 %v690_v2, %v678_v5  ;;  %v4045_v2 = vld [vmem:[#allocation11 + $0x4b8] sm:$0xf0] }
 0x142   :  { %2215 = vmatpush.bf16.msra.mxu2 %v3104_v62  ;;  %v3357_v62 = vld [vmem:[#allocation11 + $0x36c] sm:$0xf0] }
 0x143   :  { %v697_v16 = vmax.f32 %v691_v9, 0.0  ;;  %v3360_v5 = vor.u32 %v4000_v61, %v3357_v62  ;;  %v3524_v9 = vor.u32 %v4045_v2, %v3523_v1  ;;  %v3049_v61 = vld [vmem:[#allocation11 + $0x104] sm:$0xf0]  ;;  %v3412_v1 = vor.u32 %v4017_v58, %v3411_v57  ;;  %v3217_v2 = vld [vmem:[#allocation11 + $0x254] sm:$0xf0] }
 0x144   :  { %v651_v17 = vpop.f32.mrf.mxu2  ;;  %2230 = vmatpush.bf16.msra.mxu3 %v3272_v6  ;;  %v3691_v6 = vld [vmem:[#allocation11 + $0x5f0] sm:$0xf]  ;;  %v3220_v12 = vor.u32 %v3965_v0, %v3217_v2  ;;  %v3139_v57 = vld [vmem:[#allocation11 + $0x198] sm:$0xf]  ;;  %v3948_v58 = vld [vmem:[#allocation11 + $0x1b0] sm:$0xf0] }
 0x145   :  { %v664_v18 = vpop.f32.mrf.mxu3  ;;  %v652_v19 = vadd.f32 %v651_v17, %v264_v7  ;;  %v4463_v23 = vpack.c.bf16 %v697_v16, %v697_v16  ;;  %v4087_v7 = vld [vmem:[#allocation11 + $0x608] sm:$0xf0]  ;;  %v3944_v17 = vld [vmem:[#allocation11 + $0x194] sm:$0xf]  ;;  %v3307_v0 = vld [vmem:[#allocation11 + $0x2e8] sm:$0xf]  ;;  %v3140_v2 = vor.u32 %v3948_v58, %v3139_v57 }
 0x146   :  { %2216 = vmatpush.bf16.msra.mxu2 %v3076_v10  ;;  %v679_v29 = vpop.f32.mrf.mxu0  ;;  %v3993_v10 = vld [vmem:[#allocation11 + $0x31c] sm:$0xf]  ;;  %v3692_v16 = vor.u32 %v4087_v7, %v3691_v6  ;;  %v3383_v6 = vld [vmem:[#allocation11 + $0x388] sm:$0xf]  ;;  %v4010_v7 = vld [vmem:[#allocation11 + $0x3a0] sm:$0xf0] }
 0x147   :  { %v665_v28 = vadd.f32 %v664_v18, %v652_v19  ;;  %v692_v30 = vpop.f32.mrf.mxu1  ;;  %2157 = vmatmul.bf16.vlgmr.msrb.gmra.mxu1 %v4463_v23  ;;  %2183 = vmatmul.bf16.vlgmr.msrb.gmra.mxu3 %v4455_v44  ;;  %v3133_v18 = vld [vmem:[#allocation11 + $0x1ac] sm:$0xf0]  ;;  %v3332_v19 = vor.u32 %v3993_v10, %v3329_v11  ;;  %v4031_v29 = vld [vmem:[#allocation11 + $0x448] sm:$0xf0]  ;;  %v4056_v10 = vld [vmem:[#allocation11 + $0x514] sm:$0xf] }
 0x148   :  { %2231 = vmatpush.bf16.msra.mxu3 %v3244_v20  ;;  %2253 = vmatpush.bf16.msrb.mxu1 %v3804_v21  ;;  %v3663_v20 = vld [vmem:[#allocation11 + $0x5b8] sm:$0xf]  ;;  %v4080_v21 = vld [vmem:[#allocation11 + $0x5d0] sm:$0xf0]  ;;  %v3136_v27 = vor.u32 %v3944_v17, %v3133_v18  ;;  %v3581_v11 = vld [vmem:[#allocation11 + $0x52c] sm:$0xf0] }
 0x149   :  { %v696_v37 = vmax.f32 %v665_v28, 0.0  ;;  %v3467_v28 = vld [vmem:[#allocation11 + $0x430] sm:$0xf]  ;;  %v3664_v30 = vor.u32 %v4080_v21, %v3663_v20  ;;  %v4098_v17 = vld [vmem:[#allocation11 + $0x664] sm:$0xf]  ;;  %v3584_v20 = vor.u32 %v4056_v10, %v3581_v11 }
 0x14a   :  { %2217 = vmatpush.bf16.msra.mxu2 %v3048_v24  ;;  %v3496_v24 = vor.u32 %v4038_v15, %v3495_v14  ;;  %v3958_v14 = vld [vmem:[#allocation11 + $0x204] sm:$0xf]  ;;  %v3384_v15 = vor.u32 %v4010_v7, %v3383_v6  ;;  %v3749_v18 = vld [vmem:[#allocation11 + $0x67c] sm:$0xf0]  ;;  %v3909_v21 = vld [vmem:[#allocation11 + $0x7c] sm:$0xf] }
 0x14b   :  { %v4467_v45 = vpack.c.bf16 %v696_v37, %v696_v37  ;;  %v4073_v37 = vld [vmem:[#allocation11 + $0x598] sm:$0xf0]  ;;  %v3111_v6 = vld [vmem:[#allocation11 + $0x160] sm:$0xf] }
 0x14c   :  { %v653_v47 = vpop.f32.mrf.mxu2  ;;  %2232 = vmatpush.bf16.msra.mxu3 %v3216_v38  ;;  %2254 = vmatpush.bf16.msrb.mxu1 %v3776_v39  ;;  %v3468_v38 = vor.u32 %v4031_v29, %v3467_v28  ;;  %v3979_v39 = vld [vmem:[#allocation11 + $0x2ac] sm:$0xf]  ;;  %v3161_v29 = vld [vmem:[#allocation11 + $0x1e4] sm:$0xf0]  ;;  %v3941_v7 = vld [vmem:[#allocation11 + $0x178] sm:$0xf0] }
 0x14d   :  { %v666_v48 = vpop.f32.mrf.mxu3  ;;  %2144 = vmatmul.bf16.vlgmr.msrb.gmra.mxu0 %v4467_v45  ;;  %2170 = vmatmul.bf16.vlgmr.msrb.gmra.mxu2 %v4458_v55  ;;  %v3276_v47 = vor.u32 %v3979_v39, %v3273_v40  ;;  %v3951_v28 = vld [vmem:[#allocation11 + $0x1cc] sm:$0xf]  ;;  %v2965_v39 = vld [vmem:[#allocation11 + $0x5c] sm:$0xf0]  ;;  %v4042_v40 = vld [vmem:[#allocation11 + $0x4a4] sm:$0xf] }
 0x14e   :  { %2218 = vmatpush.bf16.msra.mxu2 %v3020_v32  ;;  %2240 = vmatpush.bf16.msrb.mxu0 %v3580_v33  ;;  %v3636_v32 = vor.u32 %v4073_v37, %v3635_v36  ;;  %v3930_v33 = vld [vmem:[#allocation11 + $0x124] sm:$0xf]  ;;  %v3607_v48 = vld [vmem:[#allocation11 + $0x548] sm:$0xf]  ;;  %v3363_v36 = vld [vmem:[#allocation11 + $0x358] sm:$0xf]  ;;  %v3164_v42 = vor.u32 %v3951_v28, %v3161_v29 }
 0x14f   :  { %v3080_v56 = vor.u32 %v3930_v33, %v3077_v46  ;;  %v4004_v37 = vld [vmem:[#allocation11 + $0x370] sm:$0xf0]  ;;  %v3693_v46 = vld [vmem:[#allocation11 + $0x60c] sm:$0xf0]  ;;  %v3637_v10 = vld [vmem:[#allocation11 + $0x59c] sm:$0xf0] }
 0x150   :  { %2233 = vmatpush.bf16.msra.mxu3 %v3188_v52  ;;  %2255 = vmatpush.bf16.msrb.mxu1 %v3748_v53  ;;  %v3245_v52 = vld [vmem:[#allocation11 + $0x28c] sm:$0xf0]  ;;  %v4112_v53 = vld [vmem:[#allocation11 + $0x6d4] sm:$0xf] }
 0x151   :  { %v3248_v62 = vor.u32 %v3972_v50, %v3245_v52  ;;  %v3808_v63 = vor.u32 %v4112_v53, %v3805_v54  ;;  %v4084_v33 = vld [vmem:[#allocation11 + $0x5f4] sm:$0xf]  ;;  %v3997_v50 = vld [vmem:[#allocation11 + $0x338] sm:$0xf0]  ;;  %v2937_v52 = vld [vmem:[#allocation11 + $0x24] sm:$0xf0] }
 0x152   :  { %2219 = vmatpush.bf16.msra.mxu2 %v2992_v59  ;;  %2241 = vmatpush.bf16.msrb.mxu0 %v3552_v60  ;;  %v3608_v59 = vor.u32 %v4066_v49, %v3607_v48  ;;  %v3923_v60 = vld [vmem:[#allocation11 + $0xec] sm:$0xf]  ;;  %v3335_v49 = vld [vmem:[#allocation11 + $0x320] sm:$0xf]  ;;  %v3497_v54 = vld [vmem:[#allocation11 + $0x484] sm:$0xf0] }
 0x153   :  { %v4035_v53 = vld [vmem:[#allocation11 + $0x46c] sm:$0xf]  ;;  %v4116_v28 = vld [vmem:[#allocation11 + $0x6f0] sm:$0xf0] }
 0x154   :  { %2234 = vmatpush.bf16.msra.mxu3 %v3160_v3  ;;  %2256 = vmatpush.bf16.msrb.mxu1 %v3720_v4  ;;  %v4105_v3 = vld [vmem:[#allocation11 + $0x69c] sm:$0xf]  ;;  %v3777_v4 = vld [vmem:[#allocation11 + $0x6b4] sm:$0xf0] }
 0x155   :  { %v3780_v13 = vor.u32 %v4105_v3, %v3777_v4  ;;  %v4028_v3 = vld [vmem:[#allocation11 + $0x434] sm:$0xf]  ;;  %v3469_v4 = vld [vmem:[#allocation11 + $0x44c] sm:$0xf0] }
 0x156   :  { %2220 = vmatpush.bf16.msra.mxu2 %v2964_v8  ;;  %2242 = vmatpush.bf16.msrb.mxu0 %v3524_v9  ;;  %v3916_v8 = vld [vmem:[#allocation11 + $0xb4] sm:$0xf]  ;;  %v3021_v9 = vld [vmem:[#allocation11 + $0xcc] sm:$0xf0]  ;;  %v3472_v11 = vor.u32 %v4028_v3, %v3469_v4  ;;  %v3955_v4 = vld [vmem:[#allocation11 + $0x1e8] sm:$0xf0] }
 0x157   :  { %2209 = vmatmul.bf16.vlgmr.msra.gmra.mxu1 %v4463_v23  ;;  %2235 = vmatmul.bf16.vlgmr.msra.gmra.mxu3 %v4455_v44 }
 0x158   :  { %2279 = vmatpush.bf16.msrb.mxu3 %v3360_v5  ;;  %2257 = vmatpush.bf16.msrb.mxu1 %v3692_v16  ;;  %v3052_v5 = vor.u32 %v3923_v60, %v3049_v61  ;;  %v3189_v16 = vld [vmem:[#allocation11 + $0x21c] sm:$0xf0]  ;;  %v4077_v60 = vld [vmem:[#allocation11 + $0x5bc] sm:$0xf]  ;;  %v3665_v61 = vld [vmem:[#allocation11 + $0x5d4] sm:$0xf0] }
 0x159   :  { %v3192_v26 = vor.u32 %v3958_v14, %v3189_v16  ;;  %v3112_v14 = vor.u32 %v3941_v7, %v3111_v6  ;;  %v3441_v16 = vld [vmem:[#allocation11 + $0x414] sm:$0xf0]  ;;  %v4095_v6 = vld [vmem:[#allocation11 + $0x648] sm:$0xf0] }
 0x15a   :  { %2221 = vmatpush.bf16.msra.mxu2 %v2936_v22  ;;  %2243 = vmatpush.bf16.msrb.mxu0 %v3496_v24  ;;  %v2993_v22 = vld [vmem:[#allocation11 + $0x94] sm:$0xf0]  ;;  %v4049_v24 = vld [vmem:[#allocation11 + $0x4dc] sm:$0xf] }
 0x15b   :  { %v2996_v34 = vor.u32 %v3909_v21, %v2993_v22  ;;  %v4063_v21 = vld [vmem:[#allocation11 + $0x54c] sm:$0xf]  ;;  %v3609_v22 = vld [vmem:[#allocation11 + $0x564] sm:$0xf0] }
 0x15c   :  { %2280 = vmatpush.bf16.msrb.mxu3 %v3332_v19  ;;  %2258 = vmatpush.bf16.msrb.mxu1 %v3664_v30  ;;  %v3024_v19 = vor.u32 %v3916_v8, %v3021_v9  ;;  %v4091_v30 = vld [vmem:[#allocation11 + $0x62c] sm:$0xf]  ;;  %v4070_v9 = vld [vmem:[#allocation11 + $0x584] sm:$0xf] }
 0x15d   :  { %2196 = vmatmul.bf16.vlgmr.msra.gmra.mxu0 %v4467_v45  ;;  %2222 = vmatmul.bf16.vlgmr.msra.gmra.mxu2 %v4458_v55  ;;  %v3724_v43 = vor.u32 %v4091_v30, %v3721_v31  ;;  %v4014_v30 = vld [vmem:[#allocation11 + $0x3c4] sm:$0xf]  ;;  %v3413_v31 = vld [vmem:[#allocation11 + $0x3dc] sm:$0xf0] }
 0x15e   :  { %2266 = vmatpush.bf16.msrb.mxu2 %v3136_v27  ;;  %2244 = vmatpush.bf16.msrb.mxu0 %v3468_v38  ;;  %v3752_v27 = vor.u32 %v4098_v17, %v3749_v18  ;;  %v3902_v38 = vld [vmem:[#allocation11 + $0x44] sm:$0xf]  ;;  %v3640_v17 = vor.u32 %v4070_v9, %v3637_v10  ;;  %v3083_v18 = vld [vmem:[#allocation11 + $0x128] sm:$0xf]  ;;  %v4001_v9 = vld [vmem:[#allocation11 + $0x35c] sm:$0xf] }
 0x15f   :  { %v3365_v10 = vld [vmem:[#allocation11 + $0x374] sm:$0xf0] }
 0x160   :  { %2281 = vmatpush.bf16.msrb.mxu3 %v3304_v35  ;;  %2259 = vmatpush.bf16.msrb.mxu1 %v3636_v32  ;;  %v3556_v35 = vor.u32 %v4049_v24, %v3553_v25  ;;  %v3364_v32 = vor.u32 %v4004_v37, %v3363_v36  ;;  %v3251_v24 = vld [vmem:[#allocation11 + $0x278] sm:$0xf]  ;;  %v3927_v36 = vld [vmem:[#allocation11 + $0x108] sm:$0xf0] }
 0x162   :  { %2267 = vmatpush.bf16.msrb.mxu2 %v3108_v41  ;;  %2245 = vmatpush.bf16.msrb.mxu0 %v3440_v51  ;;  %v3525_v41 = vld [vmem:[#allocation11 + $0x4bc] sm:$0xf0]  ;;  %v3895_v51 = vld [vmem:[#allocation11 + $0xc] sm:$0xf] }
 0x163   :  { %v3528_v48 = vor.u32 %v4042_v40, %v3525_v41  ;;  %v3416_v40 = vor.u32 %v4014_v30, %v3413_v31  ;;  %v3969_v41 = vld [vmem:[#allocation11 + $0x258] sm:$0xf0]  ;;  %v3141_v30 = vld [vmem:[#allocation11 + $0x1b4] sm:$0xf0] }
 0x164   :  { %2282 = vmatpush.bf16.msrb.mxu3 %v3276_v47  ;;  %2260 = vmatpush.bf16.msrb.mxu1 %v3608_v59  ;;  %v2968_v47 = vor.u32 %v3902_v38, %v2965_v39  ;;  %v3336_v59 = vor.u32 %v3997_v50, %v3335_v49  ;;  %v3223_v39 = vld [vmem:[#allocation11 + $0x240] sm:$0xf]  ;;  %v3587_v49 = vld [vmem:[#allocation11 + $0x518] sm:$0xf]  ;;  %v4060_v50 = vld [vmem:[#allocation11 + $0x530] sm:$0xf0] }
 0x165   :  { %v3588_v58 = vor.u32 %v4060_v50, %v3587_v49  ;;  %v3643_v49 = vld [vmem:[#allocation11 + $0x588] sm:$0xf]  ;;  %v4074_v50 = vld [vmem:[#allocation11 + $0x5a0] sm:$0xf0] }
 0x166   :  { %2268 = vmatpush.bf16.msrb.mxu2 %v3080_v56  ;;  %2246 = vmatpush.bf16.msrb.mxu0 %v3412_v1  ;;  %v3696_v56 = vor.u32 %v4084_v33, %v3693_v46  ;;  %v3990_v1 = vld [vmem:[#allocation11 + $0x300] sm:$0xf0]  ;;  %v4007_v33 = vld [vmem:[#allocation11 + $0x38c] sm:$0xf]  ;;  %v3385_v46 = vld [vmem:[#allocation11 + $0x3a4] sm:$0xf0] }
 0x167   :  { %2261 = vmatmul.bf16.vlgmr.msrb.gmra.mxu1 %v4463_v23  ;;  %v3308_v8 = vor.u32 %v3990_v1, %v3307_v0  ;;  %v4053_v0 = vld [vmem:[#allocation11 + $0x4f8] sm:$0xf0] }
 0x168   :  { %2283 = vmatpush.bf16.msrb.mxu3 %v3248_v62  ;;  %2305 = vmatpush.bf16.msra.mxu1 %v3808_v63  ;;  %v2940_v62 = vor.u32 %v3895_v51, %v2937_v52  ;;  %v3500_v63 = vor.u32 %v4035_v53, %v3497_v54  ;;  %v3224_v51 = vor.u32 %v3969_v41, %v3223_v39  ;;  %v3195_v54 = vld [vmem:[#allocation11 + $0x208] sm:$0xf]  ;;  %v3987_v39 = vld [vmem:[#allocation11 + $0x2ec] sm:$0xf] }
 0x169   :  { %v3388_v53 = vor.u32 %v4007_v33, %v3385_v46  ;;  %v3309_v41 = vld [vmem:[#allocation11 + $0x304] sm:$0xf0]  ;;  %v3113_v33 = vld [vmem:[#allocation11 + $0x17c] sm:$0xf0] }
 0x16a   :  { %2269 = vmatpush.bf16.msrb.mxu2 %v3052_v5  ;;  %2247 = vmatpush.bf16.msrb.mxu0 %v3384_v15  ;;  %v3668_v5 = vor.u32 %v4077_v60, %v3665_v61  ;;  %v4021_v15 = vld [vmem:[#allocation11 + $0x3fc] sm:$0xf]  ;;  %v4102_v60 = vld [vmem:[#allocation11 + $0x680] sm:$0xf0]  ;;  %v2999_v61 = vld [vmem:[#allocation11 + $0x80] sm:$0xf] }
 0x16b   :  { %v3444_v25 = vor.u32 %v4021_v15, %v3441_v16 }
 0x16c   :  { %2284 = vmatpush.bf16.msrb.mxu3 %v3220_v12  ;;  %2306 = vmatpush.bf16.msra.mxu1 %v3780_v13  ;;  %v3279_v12 = vld [vmem:[#allocation11 + $0x2b0] sm:$0xf]  ;;  %v3983_v13 = vld [vmem:[#allocation11 + $0x2c8] sm:$0xf0] }
 0x16d   :  { %2248 = vmatmul.bf16.vlgmr.msrb.gmra.mxu0 %v4467_v45 }
 0x16e   :  { %2270 = vmatpush.bf16.msrb.mxu2 %v3024_v19  ;;  %2292 = vmatpush.bf16.msra.mxu0 %v3584_v20  ;;  %v3934_v19 = vld [vmem:[#allocation11 + $0x140] sm:$0xf0]  ;;  %v3280_v20 = vor.u32 %v3983_v13, %v3279_v12  ;;  %v3531_v13 = vld [vmem:[#allocation11 + $0x4a8] sm:$0xf] }
 0x16f   :  { %v3084_v29 = vor.u32 %v3934_v19, %v3083_v18  ;;  %v3906_v12 = vld [vmem:[#allocation11 + $0x60] sm:$0xf0]  ;;  %v3699_v18 = vld [vmem:[#allocation11 + $0x5f8] sm:$0xf]  ;;  %v4088_v19 = vld [vmem:[#allocation11 + $0x610] sm:$0xf0] }
 0x170   :  { %2285 = vmatpush.bf16.msrb.mxu3 %v3192_v26  ;;  %2307 = vmatpush.bf16.msra.mxu1 %v3752_v27  ;;  %v3976_v26 = vld [vmem:[#allocation11 + $0x290] sm:$0xf0]  ;;  %v3811_v27 = vld [vmem:[#allocation11 + $0x6d8] sm:$0xf]  ;;  %v3700_v31 = vor.u32 %v4088_v19, %v3699_v18  ;;  %v3391_v18 = vld [vmem:[#allocation11 + $0x390] sm:$0xf] }
 0x171   :  { %v3252_v37 = vor.u32 %v3976_v26, %v3251_v24  ;;  %v3812_v38 = vor.u32 %v4116_v28, %v3811_v27  ;;  %v3337_v24 = vld [vmem:[#allocation11 + $0x33c] sm:$0xf0]  ;;  %v3899_v26 = vld [vmem:[#allocation11 + $0x28] sm:$0xf0]  ;;  %v3503_v27 = vld [vmem:[#allocation11 + $0x470] sm:$0xf] }
 0x172   :  { %2271 = vmatpush.bf16.msrb.mxu2 %v2996_v34  ;;  %2293 = vmatpush.bf16.msra.mxu0 %v3556_v35  ;;  %v3612_v34 = vor.u32 %v4063_v21, %v3609_v22  ;;  %v3055_v35 = vld [vmem:[#allocation11 + $0xf0] sm:$0xf]  ;;  %v3994_v22 = vld [vmem:[#allocation11 + $0x324] sm:$0xf]  ;;  %v4039_v28 = vld [vmem:[#allocation11 + $0x488] sm:$0xf0] }
 0x173   :  { %v4011_v19 = vld [vmem:[#allocation11 + $0x3a8] sm:$0xf0] }
 0x174   :  { %2286 = vmatpush.bf16.msrb.mxu3 %v3164_v42  ;;  %2308 = vmatpush.bf16.msra.mxu1 %v3724_v43  ;;  %v3783_v42 = vld [vmem:[#allocation11 + $0x6a0] sm:$0xf]  ;;  %v4109_v43 = vld [vmem:[#allocation11 + $0x6b8] sm:$0xf0] }
 0x175   :  { %v3784_v52 = vor.u32 %v4109_v43, %v3783_v42  ;;  %v3475_v42 = vld [vmem:[#allocation11 + $0x438] sm:$0xf]  ;;  %v4032_v43 = vld [vmem:[#allocation11 + $0x450] sm:$0xf0] }
 0x176   :  { %2272 = vmatpush.bf16.msrb.mxu2 %v2968_v47  ;;  %2294 = vmatpush.bf16.msra.mxu0 %v3528_v48  ;;  %v3027_v47 = vld [vmem:[#allocation11 + $0xb8] sm:$0xf]  ;;  %v3920_v48 = vld [vmem:[#allocation11 + $0xd0] sm:$0xf0] }
 0x177   :  { %2287 = vmatmul.bf16.vlgmr.msrb.gmra.mxu3 %v4455_v44  ;;  %v3028_v57 = vor.u32 %v3920_v48, %v3027_v47  ;;  %v3312_v47 = vor.u32 %v3987_v39, %v3309_v41  ;;  %v3476_v48 = vor.u32 %v4032_v43, %v3475_v42  ;;  %v3561_v39 = vld [vmem:[#allocation11 + $0x4fc] sm:$0xf0]  ;;  %v3952_v41 = vld [vmem:[#allocation11 + $0x1d4] sm:$0xf] }
 0x178   :  { %2331 = vmatpush.bf16.msra.mxu3 %v3364_v32  ;;  %2309 = vmatpush.bf16.msra.mxu1 %v3696_v56  ;;  %v3056_v32 = vor.u32 %v3927_v36, %v3055_v35  ;;  %v3962_v56 = vld [vmem:[#allocation11 + $0x220] sm:$0xf0]  ;;  %v3504_v36 = vor.u32 %v4039_v28, %v3503_v27  ;;  %v3392_v27 = vor.u32 %v4011_v19, %v3391_v18 }
 0x179   :  { %v3196_v1 = vor.u32 %v3962_v56, %v3195_v54  ;;  %v3447_v54 = vld [vmem:[#allocation11 + $0x400] sm:$0xf]  ;;  %v4025_v56 = vld [vmem:[#allocation11 + $0x418] sm:$0xf0]  ;;  %v3942_v18 = vld [vmem:[#allocation11 + $0x180] sm:$0xf0] }
 0x17a   :  { %2273 = vmatpush.bf16.msrb.mxu2 %v2940_v62  ;;  %2295 = vmatpush.bf16.msra.mxu0 %v3500_v63  ;;  %v3913_v62 = vld [vmem:[#allocation11 + $0x98] sm:$0xf0]  ;;  %v3559_v63 = vld [vmem:[#allocation11 + $0x4e0] sm:$0xf] }
 0x17b   :  { %v3000_v7 = vor.u32 %v3913_v62, %v2999_v61  ;;  %v3448_v62 = vor.u32 %v4025_v56, %v3447_v54 }
 0x17c   :  { %2332 = vmatpush.bf16.msra.mxu3 %v3336_v59  ;;  %2310 = vmatpush.bf16.msra.mxu1 %v3668_v5  ;;  %v3755_v59 = vld [vmem:[#allocation11 + $0x668] sm:$0xf]  ;;  %v3727_v5 = vld [vmem:[#allocation11 + $0x630] sm:$0xf] }
 0x17d   :  { %2274 = vmatmul.bf16.vlgmr.msrb.gmra.mxu2 %v4458_v55  ;;  %v3756_v3 = vor.u32 %v4102_v60, %v3755_v59  ;;  %v3728_v16 = vor.u32 %v4095_v6, %v3727_v5  ;;  %v3644_v59 = vor.u32 %v4074_v50, %v3643_v49  ;;  %v3615_v60 = vld [vmem:[#allocation11 + $0x550] sm:$0xf]  ;;  %v3419_v5 = vld [vmem:[#allocation11 + $0x3c8] sm:$0xf]  ;;  %v4018_v6 = vld [vmem:[#allocation11 + $0x3e0] sm:$0xf0] }
 0x17e   :  { %2318 = vmatpush.bf16.msra.mxu2 %v3140_v2  ;;  %2296 = vmatpush.bf16.msra.mxu0 %v3472_v11  ;;  %v3167_v2 = vld [vmem:[#allocation11 + $0x1d0] sm:$0xf]  ;;  %v2971_v11 = vld [vmem:[#allocation11 + $0x48] sm:$0xf]  ;;  %v4005_v49 = vld [vmem:[#allocation11 + $0x378] sm:$0xf0] }
 0x17f   :  { %v3168_v15 = vor.u32 %v3955_v4, %v3167_v2  ;;  %v3813_v4 = vld [vmem:[#allocation11 + $0x6f4] sm:$0xf0]  ;;  %v3903_v50 = vld [vmem:[#allocation11 + $0x4c] sm:$0xf] }
 0x180   :  { %2333 = vmatpush.bf16.msra.mxu3 %v3308_v8  ;;  %2311 = vmatpush.bf16.msra.mxu1 %v3640_v17  ;;  %v3560_v8 = vor.u32 %v4053_v0, %v3559_v63  ;;  %v3368_v17 = vor.u32 %v4001_v9, %v3365_v10  ;;  %v4067_v63 = vld [vmem:[#allocation11 + $0x568] sm:$0xf0]  ;;  %v3973_v0 = vld [vmem:[#allocation11 + $0x27c] sm:$0xf] }
 0x181   :  { %v3616_v9 = vor.u32 %v4067_v63, %v3615_v60  ;;  %v3998_v63 = vld [vmem:[#allocation11 + $0x340] sm:$0xf0] }
 0x182   :  { %2319 = vmatpush.bf16.msra.mxu2 %v3112_v14  ;;  %2297 = vmatpush.bf16.msra.mxu0 %v3444_v25  ;;  %v4046_v14 = vld [vmem:[#allocation11 + $0x4c0] sm:$0xf0]  ;;  %v2943_v25 = vld [vmem:[#allocation11 + $0x10] sm:$0xf] }
 0x183   :  { %v3532_v21 = vor.u32 %v4046_v14, %v3531_v13  ;;  %v2944_v35 = vor.u32 %v3899_v26, %v2943_v25  ;;  %v3225_v13 = vld [vmem:[#allocation11 + $0x25c] sm:$0xf0]  ;;  %v3420_v14 = vor.u32 %v4018_v6, %v3419_v5  ;;  %v3949_v5 = vld [vmem:[#allocation11 + $0x1b8] sm:$0xf0] }
 0x184   :  { %2334 = vmatpush.bf16.msra.mxu3 %v3280_v20  ;;  %2312 = vmatpush.bf16.msra.mxu1 %v3612_v34  ;;  %v2972_v20 = vor.u32 %v3906_v12, %v2971_v11  ;;  %v3340_v34 = vor.u32 %v3994_v22, %v3337_v24  ;;  %v3966_v12 = vld [vmem:[#allocation11 + $0x244] sm:$0xf]  ;;  %v4057_v22 = vld [vmem:[#allocation11 + $0x51c] sm:$0xf]  ;;  %v3589_v24 = vld [vmem:[#allocation11 + $0x534] sm:$0xf0] }
 0x185   :  { %v3228_v25 = vor.u32 %v3966_v12, %v3225_v13  ;;  %v3315_v12 = vld [vmem:[#allocation11 + $0x2f0] sm:$0xf] }
 0x186   :  { %2320 = vmatpush.bf16.msra.mxu2 %v3084_v29  ;;  %2298 = vmatpush.bf16.msra.mxu0 %v3416_v40  ;;  %v3945_v29 = vld [vmem:[#allocation11 + $0x19c] sm:$0xf] }
 0x187   :  { %2313 = vmatmul.bf16.vlgmr.msra.gmra.mxu1 %v4463_v23  ;;  %v3144_v40 = vor.u32 %v3945_v29, %v3141_v30  ;;  %v3959_v29 = vld [vmem:[#allocation11 + $0x20c] sm:$0xf]  ;;  %v3197_v30 = vld [vmem:[#allocation11 + $0x224] sm:$0xf0] }
 0x188   :  { %2335 = vmatpush.bf16.msra.mxu3 %v3252_v37  ;;  %2357 = vmatpush.bf16.msrb.mxu1 %v3812_v38  ;;  %v3671_v37 = vld [vmem:[#allocation11 + $0x5c0] sm:$0xf]  ;;  %v4081_v38 = vld [vmem:[#allocation11 + $0x5d8] sm:$0xf0] }
 0x189   :  { %v3672_v46 = vor.u32 %v4081_v38, %v3671_v37  ;;  %v3001_v37 = vld [vmem:[#allocation11 + $0x9c] sm:$0xf0]  ;;  %v4050_v38 = vld [vmem:[#allocation11 + $0x4e4] sm:$0xf] }
 0x18a   :  { %2321 = vmatpush.bf16.msra.mxu2 %v3056_v32  ;;  %2299 = vmatpush.bf16.msra.mxu0 %v3388_v53  ;;  %v3938_v32 = vld [vmem:[#allocation11 + $0x164] sm:$0xf]  ;;  %v3281_v53 = vld [vmem:[#allocation11 + $0x2cc] sm:$0xf0] }
 0x18c   :  { %2336 = vmatpush.bf16.msra.mxu3 %v3224_v51  ;;  %2358 = vmatpush.bf16.msrb.mxu1 %v3784_v52  ;;  %v3980_v51 = vld [vmem:[#allocation11 + $0x2b4] sm:$0xf]  ;;  %v3116_v52 = vor.u32 %v3938_v32, %v3113_v33  ;;  %v3169_v32 = vld [vmem:[#allocation11 + $0x1ec] sm:$0xf0] }
 0x18d   :  { %2300 = vmatmul.bf16.vlgmr.msra.gmra.mxu0 %v4467_v45  ;;  %v3284_v61 = vor.u32 %v3980_v51, %v3281_v53  ;;  %v4092_v33 = vld [vmem:[#allocation11 + $0x634] sm:$0xf]  ;;  %v2973_v51 = vld [vmem:[#allocation11 + $0x64] sm:$0xf0]  ;;  %v3172_v54 = vor.u32 %v3952_v41, %v3169_v32  ;;  %v4015_v32 = vld [vmem:[#allocation11 + $0x3cc] sm:$0xf] }
 0x18e   :  { %2322 = vmatpush.bf16.msra.mxu2 %v3028_v57  ;;  %2344 = vmatpush.bf16.msrb.mxu0 %v3588_v58  ;;  %v3931_v57 = vld [vmem:[#allocation11 + $0x12c] sm:$0xf]  ;;  %v3085_v58 = vld [vmem:[#allocation11 + $0x144] sm:$0xf0]  ;;  %v2976_v60 = vor.u32 %v3903_v50, %v2973_v51 }
 0x18f   :  { %v3088_v2 = vor.u32 %v3931_v57, %v3085_v58  ;;  %v3533_v53 = vld [vmem:[#allocation11 + $0x4c4] sm:$0xf0]  ;;  %v4085_v58 = vld [vmem:[#allocation11 + $0x5fc] sm:$0xf] }
 0x190   :  { %2337 = vmatpush.bf16.msra.mxu3 %v3196_v1  ;;  %2359 = vmatpush.bf16.msrb.mxu1 %v3756_v3  ;;  %v3253_v1 = vld [vmem:[#allocation11 + $0x294] sm:$0xf0]  ;;  %v4113_v3 = vld [vmem:[#allocation11 + $0x6dc] sm:$0xf] }
 0x191   :  { %v3256_v10 = vor.u32 %v3973_v0, %v3253_v1  ;;  %v3816_v11 = vor.u32 %v4113_v3, %v3813_v4  ;;  %v3896_v0 = vld [vmem:[#allocation11 + $0x14] sm:$0xf]  ;;  %v2945_v1 = vld [vmem:[#allocation11 + $0x2c] sm:$0xf0]  ;;  %v3147_v4 = vld [vmem:[#allocation11 + $0x1a0] sm:$0xf] }
 0x192   :  { %2323 = vmatpush.bf16.msra.mxu2 %v3000_v7  ;;  %2345 = vmatpush.bf16.msrb.mxu0 %v3560_v8  ;;  %v3924_v7 = vld [vmem:[#allocation11 + $0xf4] sm:$0xf]  ;;  %v3057_v8 = vld [vmem:[#allocation11 + $0x10c] sm:$0xf0]  ;;  %v3148_v13 = vor.u32 %v3949_v5, %v3147_v4 }
 0x193   :  { %v3505_v3 = vld [vmem:[#allocation11 + $0x48c] sm:$0xf0] }
 0x194   :  { %2338 = vmatpush.bf16.msra.mxu3 %v3168_v15  ;;  %2360 = vmatpush.bf16.msrb.mxu1 %v3728_v16  ;;  %v3060_v15 = vor.u32 %v3924_v7, %v3057_v8  ;;  %v4106_v16 = vld [vmem:[#allocation11 + $0x6a4] sm:$0xf]  ;;  %v2948_v8 = vor.u32 %v3896_v0, %v2945_v1  ;;  %v4061_v0 = vld [vmem:[#allocation11 + $0x538] sm:$0xf0] }
 0x196   :  { %2324 = vmatpush.bf16.msra.mxu2 %v2972_v20  ;;  %2346 = vmatpush.bf16.msrb.mxu0 %v3532_v21  ;;  %v3917_v20 = vld [vmem:[#allocation11 + $0xbc] sm:$0xf]  ;;  %v3029_v21 = vld [vmem:[#allocation11 + $0xd4] sm:$0xf0] }
 0x197   :  { %2339 = vmatmul.bf16.vlgmr.msra.gmra.mxu3 %v4455_v44  ;;  %v3032_v28 = vor.u32 %v3917_v20, %v3029_v21 }
 0x198   :  { %2383 = vmatpush.bf16.msrb.mxu3 %v3368_v17  ;;  %2361 = vmatpush.bf16.msrb.mxu1 %v3700_v31  ;;  %v3785_v17 = vld [vmem:[#allocation11 + $0x6bc] sm:$0xf0]  ;;  %v4099_v31 = vld [vmem:[#allocation11 + $0x66c] sm:$0xf] }
 0x199   :  { %v3788_v26 = vor.u32 %v4106_v16, %v3785_v17  ;;  %v3477_v16 = vld [vmem:[#allocation11 + $0x454] sm:$0xf0]  ;;  %v3119_v17 = vld [vmem:[#allocation11 + $0x168] sm:$0xf] }
 0x19a   :  { %2325 = vmatpush.bf16.msra.mxu2 %v2944_v35  ;;  %2347 = vmatpush.bf16.msrb.mxu0 %v3504_v36  ;;  %v3757_v35 = vld [vmem:[#allocation11 + $0x684] sm:$0xf0]  ;;  %v3910_v36 = vld [vmem:[#allocation11 + $0x84] sm:$0xf] }
 0x19b   :  { %v3760_v42 = vor.u32 %v4099_v31, %v3757_v35  ;;  %v3004_v43 = vor.u32 %v3910_v36, %v3001_v37  ;;  %v3935_v31 = vld [vmem:[#allocation11 + $0x148] sm:$0xf0]  ;;  %v4064_v35 = vld [vmem:[#allocation11 + $0x554] sm:$0xf] }
 0x19c   :  { %2384 = vmatpush.bf16.msrb.mxu3 %v3340_v34  ;;  %2362 = vmatpush.bf16.msrb.mxu1 %v3672_v46  ;;  %v3592_v34 = vor.u32 %v4057_v22, %v3589_v24  ;;  %v3729_v46 = vld [vmem:[#allocation11 + $0x64c] sm:$0xf0]  ;;  %v4071_v22 = vld [vmem:[#allocation11 + $0x58c] sm:$0xf]  ;;  %v3645_v24 = vld [vmem:[#allocation11 + $0x5a4] sm:$0xf0] }
 0x19d   :  { %2326 = vmatmul.bf16.vlgmr.msra.gmra.mxu2 %v4458_v55  ;;  %v3732_v56 = vor.u32 %v4092_v33, %v3729_v46  ;;  %v3421_v33 = vld [vmem:[#allocation11 + $0x3e4] sm:$0xf0]  ;;  %v3063_v46 = vld [vmem:[#allocation11 + $0xf8] sm:$0xf] }
 0x19e   :  { %2370 = vmatpush.bf16.msrb.mxu2 %v3144_v40  ;;  %2348 = vmatpush.bf16.msrb.mxu0 %v3476_v48  ;;  %v3200_v40 = vor.u32 %v3959_v29, %v3197_v30  ;;  %v3371_v48 = vld [vmem:[#allocation11 + $0x360] sm:$0xf]  ;;  %v3091_v30 = vld [vmem:[#allocation11 + $0x130] sm:$0xf] }
 0x19f   :  { %v3372_v57 = vor.u32 %v4005_v49, %v3371_v48  ;;  %v3449_v29 = vld [vmem:[#allocation11 + $0x41c] sm:$0xf0]  ;;  %v3092_v41 = vor.u32 %v3935_v31, %v3091_v30 }
 0x1a0   :  { %2385 = vmatpush.bf16.msrb.mxu3 %v3312_v47  ;;  %2363 = vmatpush.bf16.msrb.mxu1 %v3644_v59  ;;  %v3564_v47 = vor.u32 %v4050_v38, %v3561_v39  ;;  %v3701_v59 = vld [vmem:[#allocation11 + $0x614] sm:$0xf0]  ;;  %v3617_v38 = vld [vmem:[#allocation11 + $0x56c] sm:$0xf0]  ;;  %v3259_v39 = vld [vmem:[#allocation11 + $0x280] sm:$0xf] }
 0x1a1   :  { %v3704_v6 = vor.u32 %v4085_v58, %v3701_v59  ;;  %v3620_v48 = vor.u32 %v4064_v35, %v3617_v38  ;;  %v4110_v58 = vld [vmem:[#allocation11 + $0x6c0] sm:$0xf0]  ;;  %v4008_v59 = vld [vmem:[#allocation11 + $0x394] sm:$0xf] }
 0x1a2   :  { %2371 = vmatpush.bf16.msrb.mxu2 %v3116_v52  ;;  %2349 = vmatpush.bf16.msrb.mxu0 %v3448_v62  ;;  %v4043_v52 = vld [vmem:[#allocation11 + $0x4ac] sm:$0xf]  ;;  %v3343_v62 = vld [vmem:[#allocation11 + $0x328] sm:$0xf] }
 0x1a3   :  { %v3344_v7 = vor.u32 %v3998_v63, %v3343_v62  ;;  %v3921_v62 = vld [vmem:[#allocation11 + $0xd8] sm:$0xf0]  ;;  %v3595_v63 = vld [vmem:[#allocation11 + $0x520] sm:$0xf] }
 0x1a4   :  { %2386 = vmatpush.bf16.msrb.mxu3 %v3284_v61  ;;  %2364 = vmatpush.bf16.msrb.mxu1 %v3616_v9  ;;  %v3536_v61 = vor.u32 %v4043_v52, %v3533_v53  ;;  %v3231_v52 = vld [vmem:[#allocation11 + $0x248] sm:$0xf]  ;;  %v3970_v53 = vld [vmem:[#allocation11 + $0x260] sm:$0xf0] }
 0x1a5   :  { %v3232_v1 = vor.u32 %v3970_v53, %v3231_v52 }
 0x1a6   :  { %2372 = vmatpush.bf16.msrb.mxu2 %v3088_v2  ;;  %2350 = vmatpush.bf16.msrb.mxu0 %v3420_v14  ;;  %v4036_v2 = vld [vmem:[#allocation11 + $0x474] sm:$0xf]  ;;  %v3991_v14 = vld [vmem:[#allocation11 + $0x308] sm:$0xf0] }
 0x1a7   :  { %2365 = vmatmul.bf16.vlgmr.msrb.gmra.mxu1 %v4463_v23  ;;  %v3508_v9 = vor.u32 %v4036_v2, %v3505_v3  ;;  %v3316_v20 = vor.u32 %v3991_v14, %v3315_v12  ;;  %v3914_v12 = vld [vmem:[#allocation11 + $0xa0] sm:$0xf0] }
 0x1a8   :  { %2387 = vmatpush.bf16.msrb.mxu3 %v3256_v10  ;;  %2409 = vmatpush.bf16.msra.mxu1 %v3816_v11  ;;  %v4078_v10 = vld [vmem:[#allocation11 + $0x5c4] sm:$0xf]  ;;  %v3673_v11 = vld [vmem:[#allocation11 + $0x5dc] sm:$0xf0] }
 0x1a9   :  { %v3676_v19 = vor.u32 %v4078_v10, %v3673_v11  ;;  %v4103_v10 = vld [vmem:[#allocation11 + $0x688] sm:$0xf0]  ;;  %v3007_v11 = vld [vmem:[#allocation11 + $0x88] sm:$0xf]  ;;  %v4054_v14 = vld [vmem:[#allocation11 + $0x500] sm:$0xf0] }
 0x1aa   :  { %2373 = vmatpush.bf16.msrb.mxu2 %v3060_v15  ;;  %2351 = vmatpush.bf16.msrb.mxu0 %v3392_v27  ;;  %v4029_v15 = vld [vmem:[#allocation11 + $0x43c] sm:$0xf]  ;;  %v3984_v27 = vld [vmem:[#allocation11 + $0x2d0] sm:$0xf0] }
 0x1ab   :  { %v3480_v21 = vor.u32 %v4029_v15, %v3477_v16 }
 0x1ac   :  { %2388 = vmatpush.bf16.msrb.mxu3 %v3228_v25  ;;  %2410 = vmatpush.bf16.msra.mxu1 %v3788_v26  ;;  %v3287_v25 = vld [vmem:[#allocation11 + $0x2b8] sm:$0xf]  ;;  %v3120_v26 = vor.u32 %v3942_v18, %v3119_v17  ;;  %v3008_v18 = vor.u32 %v3914_v12, %v3007_v11  ;;  %v4019_v11 = vld [vmem:[#allocation11 + $0x3e8] sm:$0xf0] }
 0x1ad   :  { %2352 = vmatmul.bf16.vlgmr.msrb.gmra.mxu0 %v4467_v45  ;;  %v3288_v36 = vor.u32 %v3984_v27, %v3287_v25  ;;  %v4096_v25 = vld [vmem:[#allocation11 + $0x650] sm:$0xf0]  ;;  %v3907_v27 = vld [vmem:[#allocation11 + $0x68] sm:$0xf0] }
 0x1ae   :  { %2374 = vmatpush.bf16.msrb.mxu2 %v3032_v28  ;;  %2396 = vmatpush.bf16.msra.mxu0 %v3592_v34  ;;  %v4022_v28 = vld [vmem:[#allocation11 + $0x404] sm:$0xf]  ;;  %v3648_v34 = vor.u32 %v4071_v22, %v3645_v24 }
 0x1af   :  { %v3452_v37 = vor.u32 %v4022_v28, %v3449_v29  ;;  %v3539_v28 = vld [vmem:[#allocation11 + $0x4b0] sm:$0xf]  ;;  %v4047_v29 = vld [vmem:[#allocation11 + $0x4c8] sm:$0xf0] }
 0x1b0   :  { %2389 = vmatpush.bf16.msrb.mxu3 %v3200_v40  ;;  %2411 = vmatpush.bf16.msra.mxu1 %v3760_v42  ;;  %v3977_v40 = vld [vmem:[#allocation11 + $0x298] sm:$0xf0]  ;;  %v3819_v42 = vld [vmem:[#allocation11 + $0x6e0] sm:$0xf]  ;;  %v3540_v38 = vor.u32 %v4047_v29, %v3539_v28 }
 0x1b1   :  { %v3260_v50 = vor.u32 %v3977_v40, %v3259_v39  ;;  %v4491_v39 = vld [vmem:[#allocation13] sm:$0x7f]  ;;  %v2951_v40 = vld [vmem:[#allocation11 + $0x18] sm:$0xf] }
 0x1b2   :  { %2375 = vmatpush.bf16.msrb.mxu2 %v3004_v43  ;;  %2397 = vmatpush.bf16.msra.mxu0 %v3564_v47  ;;  %v4117_v43 = vld [vmem:[#allocation11 + $0x6f8] sm:$0xf0]  ;;  %v3928_v47 = vld [vmem:[#allocation11 + $0x110] sm:$0xf0] }
 0x1b3   :  { %v3820_v51 = vor.u32 %v4117_v43, %v3819_v42  ;;  %v3511_v43 = vld [vmem:[#allocation11 + $0x478] sm:$0xf] }
 0x1b4   :  { %2390 = vmatpush.bf16.msrb.mxu3 %v3172_v54  ;;  %2412 = vmatpush.bf16.msra.mxu1 %v3732_v56  ;;  %v3424_v54 = vor.u32 %v4015_v32, %v3421_v33  ;;  %v3064_v56 = vor.u32 %v3928_v47, %v3063_v46  ;;  %v4040_v32 = vld [vmem:[#allocation11 + $0x490] sm:$0xf0] }
 0x1b5   :  { %v3512_v53 = vor.u32 %v4040_v32, %v3511_v43 }
 0x1b6   :  { %2376 = vmatpush.bf16.msrb.mxu2 %v2976_v60  ;;  %2398 = vmatpush.bf16.msra.mxu0 %v3536_v61  ;;  %v3393_v60 = vld [vmem:[#allocation11 + $0x3ac] sm:$0xf0]  ;;  %v3035_v61 = vld [vmem:[#allocation11 + $0xc0] sm:$0xf] }
 0x1b7   :  { %2391 = vmatmul.bf16.vlgmr.msrb.gmra.mxu3 %v4455_v44  ;;  %v3396_v4 = vor.u32 %v4008_v59, %v3393_v60  ;;  %v3036_v5 = vor.u32 %v3921_v62, %v3035_v61 }
 0x1b8   :  { %2435 = vmatpush.bf16.msra.mxu3 %v3372_v57  ;;  %2413 = vmatpush.bf16.msra.mxu1 %v3704_v6  ;;  %v3791_v57 = vld [vmem:[#allocation11 + $0x6a8] sm:$0xf]  ;;  %v3203_v6 = vld [vmem:[#allocation11 + $0x210] sm:$0xf] }
 0x1b9   :  { %v3792_v2 = vor.u32 %v4110_v58, %v3791_v57  ;;  %v4033_v58 = vld [vmem:[#allocation11 + $0x458] sm:$0xf0] }
 0x1ba   :  { %2377 = vmatpush.bf16.msrb.mxu2 %v2948_v8  ;;  %2399 = vmatpush.bf16.msra.mxu0 %v3508_v9  ;;  %v4487_v49 = vpop.f32.mrf.mxu3  ;;  %v3763_v8 = vld [vmem:[#allocation11 + $0x670] sm:$0xf]  ;;  %v3596_v9 = vor.u32 %v4061_v0, %v3595_v63  ;;  %v4075_v0 = vld [vmem:[#allocation11 + $0x5a8] sm:$0xf0] }
 0x1bb   :  { %v3764_v17 = vor.u32 %v4103_v10, %v3763_v8  ;;  %v3651_v63 = vld [vmem:[#allocation11 + $0x590] sm:$0xf]  ;;  %v3623_v8 = vld [vmem:[#allocation11 + $0x558] sm:$0xf] }
 0x1bc   :  { %2436 = vmatpush.bf16.msra.mxu3 %v3344_v7  ;;  %2414 = vmatpush.bf16.msra.mxu1 %v3676_v19  ;;  %v3963_v7 = vld [vmem:[#allocation11 + $0x228] sm:$0xf0]  ;;  %v3175_v19 = vld [vmem:[#allocation11 + $0x1d8] sm:$0xf]  ;;  %v3427_v10 = vld [vmem:[#allocation11 + $0x3d0] sm:$0xf] }
 0x1bd   :  { %2378 = vmatmul.bf16.vlgmr.msrb.gmra.mxu2 %v4458_v55  ;;  %v3204_v16 = vor.u32 %v3963_v7, %v3203_v6 }
 0x1be   :  { %2422 = vmatpush.bf16.msra.mxu2 %v3148_v13  ;;  %2400 = vmatpush.bf16.msra.mxu0 %v3480_v21  ;;  %v3567_v13 = vld [vmem:[#allocation11 + $0x4e8] sm:$0xf]  ;;  %v3735_v21 = vld [vmem:[#allocation11 + $0x638] sm:$0xf] }
 0x1bf   :  { %v3568_v24 = vor.u32 %v4054_v14, %v3567_v13  ;;  %v3736_v31 = vor.u32 %v4096_v25, %v3735_v21  ;;  %v3428_v14 = vor.u32 %v4019_v11, %v3427_v10  ;;  %v2477_v21 = vperm.slane %v4491_v39, 1 }
 0x1c0   :  { %2437 = vmatpush.bf16.msra.mxu3 %v3316_v20  ;;  %2415 = vmatpush.bf16.msra.mxu1 %v3648_v34  ;;  %v2119_v3 = vpop.f32.mrf.mxu2  ;;  %v3956_v20 = vld [vmem:[#allocation11 + $0x1f0] sm:$0xf0] }
 0x1c1   :  { %v3176_v30 = vor.u32 %v3956_v20, %v3175_v19  ;;  %v2133_v42 = vadd.f32 %v4487_v49, %v2119_v3  ;;  %v3483_v49 = vld [vmem:[#allocation11 + $0x440] sm:$0xf]  ;;  %v4026_v3 = vld [vmem:[#allocation11 + $0x420] sm:$0xf0] }
 0x1c2   :  { %2423 = vmatpush.bf16.msra.mxu2 %v3120_v26  ;;  %2401 = vmatpush.bf16.msra.mxu0 %v3452_v37  ;;  %v2134_v15 = vpop.f32.mrf.mxu3  ;;  %v2979_v26 = vld [vmem:[#allocation11 + $0x50] sm:$0xf]  ;;  %v4089_v37 = vld [vmem:[#allocation11 + $0x618] sm:$0xf0]  ;;  %v3484_v62 = vor.u32 %v4033_v58, %v3483_v49 }
 0x1c3   :  { %v2980_v35 = vor.u32 %v3907_v27, %v2979_v26 }
 0x1c4   :  { %2438 = vmatpush.bf16.msra.mxu3 %v3288_v36  ;;  %2416 = vmatpush.bf16.msra.mxu1 %v3620_v48  ;;  %v2158_v22 = vpop.f32.mrf.mxu1  ;;  %v3707_v36 = vld [vmem:[#allocation11 + $0x600] sm:$0xf]  ;;  %v2476_v48 = vperm.slane %v4491_v39, 0 }
 0x1c6   :  { %2424 = vmatpush.bf16.msra.mxu2 %v3092_v41  ;;  %2402 = vmatpush.bf16.msra.mxu0 %v3424_v54  ;;  %v3900_v41 = vld [vmem:[#allocation11 + $0x30] sm:$0xf0]  ;;  %v3679_v54 = vld [vmem:[#allocation11 + $0x5c8] sm:$0xf] }
 0x1c7   :  { %2417 = vmatmul.bf16.vlgmr.msra.gmra.mxu1 %v4463_v23 }
 0x1c8   :  { %2439 = vmatpush.bf16.msra.mxu3 %v3260_v50  ;;  %2461 = vmatpush.bf16.msrb.mxu1 %v3820_v51  ;;  %v2121_v34 = vpop.f32.mrf.mxu2  ;;  %v3708_v50 = vor.u32 %v4089_v37, %v3707_v36  ;;  %v2952_v51 = vor.u32 %v3900_v41, %v2951_v40 }
 0x1ca   :  { %2425 = vmatpush.bf16.msra.mxu2 %v3064_v56  ;;  %2403 = vmatpush.bf16.msra.mxu0 %v3396_v4  ;;  %v2145_v33 = vpop.f32.mrf.mxu0  ;;  %v2184_v46 = vpop.f32.mrf.mxu3  ;;  %v4082_v56 = vld [vmem:[#allocation11 + $0x5e0] sm:$0xf0] }
 0x1cb   :  { %v2146_v47 = vadd.f32 %v2145_v33, %v2133_v42  ;;  %v3680_v60 = vor.u32 %v4082_v56, %v3679_v54 }
 0x1cc   :  { %2440 = vmatpush.bf16.msra.mxu3 %v3232_v1  ;;  %2462 = vmatpush.bf16.msrb.mxu1 %v3792_v2  ;;  %v2160_v52 = vpop.f32.mrf.mxu1  ;;  %v3455_v2 = vld [vmem:[#allocation11 + $0x408] sm:$0xf] }
 0x1cd   :  { %2404 = vmatmul.bf16.vlgmr.msra.gmra.mxu0 %v4467_v45  ;;  %v2159_v57 = vadd.f32 %v2158_v22, %v2146_v47  ;;  %v3456_v7 = vor.u32 %v4026_v3, %v3455_v2 }
 0x1ce   :  { %2426 = vmatpush.bf16.msra.mxu2 %v3036_v5  ;;  %2448 = vmatpush.bf16.msrb.mxu0 %v3596_v9  ;;  %v4068_v9 = vld [vmem:[#allocation11 + $0x570] sm:$0xf0] }
 0x1cf   :  { %v2490_v59 = vadd.f32 %v2476_v48, %v2159_v57  ;;  %v3624_v12 = vor.u32 %v4068_v9, %v3623_v8 }
 0x1d0   :  { %2441 = vmatpush.bf16.msra.mxu3 %v3204_v16  ;;  %2463 = vmatpush.bf16.msrb.mxu1 %v3764_v17  ;;  %v2171_v61 = vpop.f32.mrf.mxu2  ;;  %v3399_v16 = vld [vmem:[#allocation11 + $0x398] sm:$0xf] }
 0x1d1   :  { %v3821_v1 = vmul.f32 -1.442695, %v2490_v59  ;;  %v2185_v15 = vadd.f32 %v2184_v46, %v2171_v61 }
 0x1d2   :  { %2427 = vmatpush.bf16.msra.mxu2 %v3008_v18  ;;  %2449 = vmatpush.bf16.msrb.mxu0 %v3568_v24  ;;  %v2147_v4 = vpop.f32.mrf.mxu0  ;;  %v2186_v5 = vpop.f32.mrf.mxu3 }
 0x1d3   :  { %4132 = vpow2.f32 %v3821_v1 }
 0x1d4   :  { %2442 = vmatpush.bf16.msra.mxu3 %v3176_v30  ;;  %2464 = vmatpush.bf16.msrb.mxu1 %v3736_v31  ;;  %v2210_v6 = vpop.f32.mrf.mxu1 }
 0x1d6   :  { %2428 = vmatpush.bf16.msra.mxu2 %v2980_v35  ;;  %2450 = vmatpush.bf16.msrb.mxu0 %v3540_v38 }
 0x1d7   :  { %2443 = vmatmul.bf16.vlgmr.msra.gmra.mxu3 %v4455_v44  ;;  %v3652_v44 = vor.u32 %v4075_v0, %v3651_v63 }
 0x1d8   :  { %2465 = vmatpush.bf16.msrb.mxu1 %v3708_v50  ;;  %v2173_v13 = vpop.f32.mrf.mxu2 }
 0x1d9   :  { %v4133_v17 = vpop.eup %4132 }
 0x1da   :  { %2429 = vmatpush.bf16.msra.mxu2 %v2952_v51  ;;  %2451 = vmatpush.bf16.msrb.mxu0 %v3512_v53  ;;  %v2197_v18 = vpop.f32.mrf.mxu0  ;;  %v2236_v19 = vpop.f32.mrf.mxu3  ;;  %v2518_v25 = vadd.f32 1.0, %v4133_v17  ;;  %v2478_v51 = vperm.slane %v4491_v39, 2 }
 0x1db   :  { %v2198_v20 = vadd.f32 %v2197_v18, %v2185_v15 }
 0x1dc   :  { %2466 = vmatpush.bf16.msrb.mxu1 %v3680_v60  ;;  %v2212_v22 = vpop.f32.mrf.mxu1  ;;  %4134 = vrcp.f32 %v2518_v25  ;;  %v2536_v57 = vand.u32 2147483648, %v2518_v25  ;;  %vm2530_vm4 = vweird.f32 %v2518_v25  ;;  %v2534_v59 = vand.u32 2147483647, %v2518_v25 }
 0x1dd   :  { %2430 = vmatmul.bf16.vlgmr.msra.gmra.mxu2 %v4458_v55  ;;  %v4012_v55 = vld [vmem:[#allocation11 + $0x3b0] sm:$0xf0]  ;;  %v2211_v26 = vadd.f32 %v2210_v6, %v2198_v20 }
 0x1de   :  { %2452 = vmatpush.bf16.msrb.mxu0 %v3484_v62  ;;  %v3400_v24 = vor.u32 %v4012_v55, %v3399_v16  ;;  %v2537_v63 = vor.u32 1.1754944e-38, %v2536_v57  ;;  %vm2535_vm9 = vcmp.eq.f32.partialorder %v2534_v59, 8.507059e+37 }
 0x1df   :  { %v2491_v27 = vadd.f32 %v2477_v21, %v2211_v26 }
 0x1e0   :  { %2467 = vmatpush.bf16.msrb.mxu1 %v3652_v44  ;;  %v2223_v29 = vpop.f32.mrf.mxu2 }
 0x1e1   :  { %v3822_v28 = vmul.f32 -1.442695, %v2491_v27  ;;  %v2237_v43 = vadd.f32 %v2236_v19, %v2223_v29 }
 0x1e2   :  { %2453 = vmatpush.bf16.msrb.mxu0 %v3456_v7  ;;  %v2199_v30 = vpop.f32.mrf.mxu0  ;;  %v2238_v31 = vpop.f32.mrf.mxu3 }
 0x1e3   :  { %4136 = vpow2.f32 %v3822_v28  ;;  %v4135_v35 = vpop.eup %4134 }
 0x1e4   :  { %2468 = vmatpush.bf16.msrb.mxu1 %v3624_v12  ;;  %v2262_v34 = vpop.f32.mrf.mxu1  ;;  %v2526_v38 = vmul.f32 %v4135_v35, %v2518_v25  ;;  %vm2531_vm2 = vweird.f32 %v4135_v35  ;;  %v2479_v12 = vperm.slane %v4491_v39, 3 }
 0x1e5   :  { %vm2532_vm6 = vmor %vm2530_vm4, %vm2531_vm2 }
 0x1e6   :  { %2454 = vmatpush.bf16.msrb.mxu0 %v3428_v14 }
 0x1e7   :  { %2469 = vmatmul.bf16.vlgmr.msrb.gmra.mxu1 %v4463_v23  ;;  %v2527_v23 = vsub.f32 1.0, %v2526_v38 }
 0x1e8   :  { %v2225_v37 = vpop.f32.mrf.mxu2 }
 0x1e9   :  { %v4137_v36 = vpop.eup %4136  ;;  %v2528_v46 = vmul.f32 %v4135_v35, %v2527_v23 }
 0x1ea   :  { %2455 = vmatpush.bf16.msrb.mxu0 %v3400_v24  ;;  %v2519_v40 = vadd.f32 1.0, %v4137_v36  ;;  %v2249_v41 = vpop.f32.mrf.mxu0 }
 0x1eb   :  { %v2250_v32 = vadd.f32 %v2249_v41, %v2237_v43  ;;  %v2529_v52 = vadd.f32 %v4135_v35, %v2528_v46 }
 0x1ec   :  { %4138 = vrcp.f32 %v2519_v40  ;;  %v2264_v42 = vpop.f32.mrf.mxu1  ;;  %v2551_v53 = vand.u32 2147483648, %v2519_v40  ;;  %v2549_v49 = vand.u32 2147483647, %v2519_v40  ;;  %vm2545_vm5 = vweird.f32 %v2519_v40 }
 0x1ed   :  { %2456 = vmatmul.bf16.vlgmr.msrb.gmra.mxu0 %v4467_v45  ;;  %v2263_v50 = vadd.f32 %v2262_v34, %v2250_v32  ;;  %v2533_v61 = vsel %vm2532_vm6, %v4135_v35, %v2529_v52 }
 0x1ee   :  { %v2552_v62 = vor.u32 1.1754944e-38, %v2551_v53  ;;  %vm2550_vm8 = vcmp.eq.f32.partialorder %v2549_v49, 8.507059e+37  ;;  %v2538_v4 = vsel %vm2535_vm9, %v2537_v63, %v2533_v61 }
 0x1ef   :  { %v2492_v58 = vadd.f32 %v2478_v51, %v2263_v50 }
 0x1f1   :  { %v3823_v1 = vmul.f32 -1.442695, %v2492_v58 }
 0x1f2   :  { %v4139_v33 = vpop.eup %4138  ;;  %v2251_v48 = vpop.f32.mrf.mxu0 }
 0x1f3   :  { %v2541_v47 = vmul.f32 %v4139_v33, %v2519_v40  ;;  %vm2546_vm3 = vweird.f32 %v4139_v33  ;;  %4140 = vpow2.f32 %v3823_v1 }
 0x1f4   :  { %vm2547_vm7 = vmor %vm2545_vm5, %vm2546_vm3 }
 0x1f5   :  { %v2542_v45 = vsub.f32 1.0, %v2541_v47 }
 0x1f7   :  { %v2543_v54 = vmul.f32 %v4139_v33, %v2542_v45 }
 0x1f9   :  { %v2544_v60 = vadd.f32 %v4139_v33, %v2543_v54  ;;  %v4141_v8 = vpop.eup %4140 }
 0x1fa   :  { %v2288_v56 = vpop.f32.mrf.mxu3  ;;  %v2520_v13 = vadd.f32 1.0, %v4141_v8 }
 0x1fb   :  { %v2548_v0 = vsel %vm2547_vm7, %v4139_v33, %v2544_v60 }
 0x1fc   :  { %v2553_v2 = vsel %vm2550_vm8, %v2552_v62, %v2548_v0  ;;  %4142 = vrcp.f32 %v2520_v13  ;;  %vm2560_vm11 = vweird.f32 %v2520_v13  ;;  %v2566_v36 = vand.u32 2147483648, %v2520_v13 }
 0x1fd   :  { %v2630_v5 = vpack.c.bf16 %v2553_v2, %v2538_v4  ;;  %v2564_v40 = vand.u32 2147483647, %v2520_v13 }
 0x1fe   :  { %v2567_v33 = vor.u32 1.1754944e-38, %v2566_v36 }
 0x1ff   :  { %2634 = vst [vmem:[#allocation14] sm:$0xff] %v2630_v5  ;;  %vm2565_vm0 = vcmp.eq.f32.partialorder %v2564_v40, 8.507059e+37 }
 0x200   :  { %v2275_v3 = vpop.f32.mrf.mxu2 }
 0x201   :  { %v2289_v9 = vadd.f32 %v2288_v56, %v2275_v3  ;;  %v2480_v56 = vperm.slane %v4491_v39, 4  ;;  %v2481_v3 = vperm.slane %v4491_v39, 5 }
 0x202   :  { %v2290_v44 = vpop.f32.mrf.mxu3  ;;  %v4143_v18 = vpop.eup %4142 }
 0x203   :  { %v2556_v21 = vmul.f32 %v4143_v18, %v2520_v13  ;;  %vm2561_vm10 = vweird.f32 %v4143_v18 }
 0x204   :  { %v2314_v6 = vpop.f32.mrf.mxu1  ;;  %vm2562_vm13 = vmor %vm2560_vm11, %vm2561_vm10 }
 0x205   :  { %v2557_v24 = vsub.f32 1.0, %v2556_v21 }
 0x207   :  { %v2558_v27 = vmul.f32 %v4143_v18, %v2557_v24 }
 0x208   :  { %v2277_v7 = vpop.f32.mrf.mxu2 }
 0x209   :  { %v2559_v35 = vadd.f32 %v4143_v18, %v2558_v27 }
 0x20a   :  { %v2301_v10 = vpop.f32.mrf.mxu0 }
 0x20b   :  { %v2302_v11 = vadd.f32 %v2301_v10, %v2289_v9  ;;  %v2563_v23 = vsel %vm2562_vm13, %v4143_v18, %v2559_v35 }
 0x20c   :  { %v2316_v14 = vpop.f32.mrf.mxu1  ;;  %v2568_v48 = vsel %vm2565_vm0, %v2567_v33, %v2563_v23 }
 0x20d   :  { %v2315_v15 = vadd.f32 %v2314_v6, %v2302_v11 }
 0x20f   :  { %v2493_v16 = vadd.f32 %v2479_v12, %v2315_v15 }
 0x211   :  { %v3824_v55 = vmul.f32 -1.442695, %v2493_v16 }
 0x212   :  { %v2303_v17 = vpop.f32.mrf.mxu0 }
 0x213   :  { %4144 = vpow2.f32 %v3824_v55 }
 0x219   :  { %v4145_v20 = vpop.eup %4144 }
 0x21a   :  { %v2340_v19 = vpop.f32.mrf.mxu3  ;;  %v2521_v22 = vadd.f32 1.0, %v4145_v20 }
 0x21c   :  { %4146 = vrcp.f32 %v2521_v22  ;;  %v2581_v37 = vand.u32 2147483648, %v2521_v22  ;;  %v2579_v41 = vand.u32 2147483647, %v2521_v22  ;;  %vm2575_vm14 = vweird.f32 %v2521_v22 }
 0x21e   :  { %v2582_v46 = vor.u32 1.1754944e-38, %v2581_v37  ;;  %vm2580_vm1 = vcmp.eq.f32.partialorder %v2579_v41, 8.507059e+37 }
 0x220   :  { %v2327_v25 = vpop.f32.mrf.mxu2 }
 0x221   :  { %v2341_v51 = vadd.f32 %v2340_v19, %v2327_v25 }
 0x222   :  { %v2342_v26 = vpop.f32.mrf.mxu3  ;;  %v4147_v28 = vpop.eup %4146 }
 0x223   :  { %v2571_v30 = vmul.f32 %v4147_v28, %v2521_v22  ;;  %vm2576_vm12 = vweird.f32 %v4147_v28 }
 0x224   :  { %v2366_v29 = vpop.f32.mrf.mxu1  ;;  %vm2577_vm15 = vmor %vm2575_vm14, %vm2576_vm12  ;;  %vm2637_vm14 = vcmask 125952  }
 0x225   :  { %v2572_v31 = vsub.f32 1.0, %v2571_v30 }
 0x227   :  { %v2573_v38 = vmul.f32 %v4147_v28, %v2572_v31 }
 0x228   :  { %v2329_v34 = vpop.f32.mrf.mxu2 }
 0x229   :  { %v2574_v43 = vadd.f32 %v4147_v28, %v2573_v38  ;;  %v2482_v34 = vperm.slane %v4491_v39, 6 }
 0x22a   :  { %v2353_v42 = vpop.f32.mrf.mxu0 }
 0x22b   :  { %v2578_v47 = vsel %vm2577_vm15, %v4147_v28, %v2574_v43  ;;  %v2354_v52 = vadd.f32 %v2353_v42, %v2341_v51 }
 0x22c   :  { %v2368_v32 = vpop.f32.mrf.mxu1  ;;  %v2583_v50 = vsel %vm2580_vm1, %v2582_v46, %v2578_v47 }
 0x22d   :  { %v2631_v45 = vpack.c.bf16 %v2583_v50, %v2568_v48  ;;  %v2367_v54 = vadd.f32 %v2366_v29, %v2354_v52 }
 0x22f   :  { %2635 = vst [vmem:[#allocation14 + $0x8] sm:$0xff] %v2631_v45  ;;  %v2494_v49 = vadd.f32 %v2480_v56, %v2367_v54 }
 0x231   :  { %v3825_v58 = vmul.f32 -1.442695, %v2494_v49 }
 0x232   :  { %v2355_v53 = vpop.f32.mrf.mxu0 }
 0x233   :  { %4148 = vpow2.f32 %v3825_v58 }
 0x239   :  { %v4149_v63 = vpop.eup %4148 }
 0x23a   :  { %v2392_v57 = vpop.f32.mrf.mxu3  ;;  %v2522_v4 = vadd.f32 1.0, %v4149_v63 }
 0x23c   :  { %4150 = vrcp.f32 %v2522_v4  ;;  %vm2590_vm3 = vweird.f32 %v2522_v4  ;;  %v2596_v25 = vand.u32 2147483648, %v2522_v4  ;;  %v2594_v29 = vand.u32 2147483647, %v2522_v4 }
 0x23e   :  { %v2597_v40 = vor.u32 1.1754944e-38, %v2596_v25  ;;  %vm2595_vm8 = vcmp.eq.f32.partialorder %v2594_v29, 8.507059e+37 }
 0x240   :  { %v2379_v59 = vpop.f32.mrf.mxu2 }
 0x241   :  { %v2393_v0 = vadd.f32 %v2392_v57, %v2379_v59 }
 0x242   :  { %v2394_v60 = vpop.f32.mrf.mxu3  ;;  %v4151_v9 = vpop.eup %4150 }
 0x243   :  { %v2586_v12 = vmul.f32 %v4151_v9, %v2522_v4  ;;  %vm2591_vm2 = vweird.f32 %v4151_v9 }
 0x244   :  { %v2418_v61 = vpop.f32.mrf.mxu1  ;;  %vm2592_vm5 = vmor %vm2590_vm3, %vm2591_vm2 }
 0x245   :  { %v2587_v15 = vsub.f32 1.0, %v2586_v12 }
 0x247   :  { %v2588_v55 = vmul.f32 %v4151_v9, %v2587_v15 }
 0x248   :  { %v2381_v62 = vpop.f32.mrf.mxu2 }
 0x249   :  { %v2589_v22 = vadd.f32 %v4151_v9, %v2588_v55 }
 0x24a   :  { %v2405_v1 = vpop.f32.mrf.mxu0 }
 0x24b   :  { %v2406_v2 = vadd.f32 %v2405_v1, %v2393_v0  ;;  %v2593_v35 = vsel %vm2592_vm5, %v4151_v9, %v2589_v22 }
 0x24c   :  { %v2420_v5 = vpop.f32.mrf.mxu1  ;;  %v2598_v43 = vsel %vm2595_vm8, %v2597_v40, %v2593_v35 }
 0x24d   :  { %v2419_v44 = vadd.f32 %v2418_v61, %v2406_v2 }
 0x24f   :  { %v2495_v6 = vadd.f32 %v2481_v3, %v2419_v44 }
 0x251   :  { %v3826_v7 = vmul.f32 -1.442695, %v2495_v6 }
 0x252   :  { %v2407_v8 = vpop.f32.mrf.mxu0 }
 0x253   :  { %4152 = vpow2.f32 %v3826_v7 }
 0x259   :  { %v4153_v11 = vpop.eup %4152 }
 0x25a   :  { %v2444_v10 = vpop.f32.mrf.mxu3  ;;  %v2523_v13 = vadd.f32 1.0, %v4153_v11 }
 0x25c   :  { %4154 = vrcp.f32 %v2523_v13  ;;  %v2611_v26 = vand.u32 2147483648, %v2523_v13  ;;  %v2609_v30 = vand.u32 2147483647, %v2523_v13  ;;  %vm2605_vm6 = vweird.f32 %v2523_v13 }
 0x25e   :  { %v2612_v41 = vor.u32 1.1754944e-38, %v2611_v26  ;;  %vm2610_vm9 = vcmp.eq.f32.partialorder %v2609_v30, 8.507059e+37 }
 0x260   :  { %v2431_v14 = vpop.f32.mrf.mxu2 }
 0x261   :  { %v2445_v24 = vadd.f32 %v2444_v10, %v2431_v14 }
 0x262   :  { %v2446_v16 = vpop.f32.mrf.mxu3  ;;  %v4155_v17 = vpop.eup %4154 }
 0x263   :  { %v2601_v19 = vmul.f32 %v4155_v17, %v2523_v13  ;;  %vm2606_vm4 = vweird.f32 %v4155_v17 }
 0x264   :  { %v2470_v18 = vpop.f32.mrf.mxu1  ;;  %vm2607_vm7 = vmor %vm2605_vm6, %vm2606_vm4 }
 0x265   :  { %v2602_v21 = vsub.f32 1.0, %v2601_v19 }
 0x267   :  { %v2603_v27 = vmul.f32 %v4155_v17, %v2602_v21 }
 0x268   :  { %v2433_v20 = vpop.f32.mrf.mxu2 }
 0x269   :  { %v2604_v36 = vadd.f32 %v4155_v17, %v2603_v27 }
 0x26a   :  { %v2457_v28 = vpop.f32.mrf.mxu0 }
 0x26b   :  { %v2458_v31 = vadd.f32 %v2457_v28, %v2445_v24  ;;  %v2608_v42 = vsel %vm2607_vm7, %v4155_v17, %v2604_v36 }
 0x26c   :  { %v2472_v38 = vpop.f32.mrf.mxu1  ;;  %v2613_v32 = vsel %vm2610_vm9, %v2612_v41, %v2608_v42 }
 0x26d   :  { %v2471_v37 = vadd.f32 %v2470_v18, %v2458_v31  ;;  %v2632_v33 = vpack.c.bf16 %v2613_v32, %v2598_v43 }
 0x26f   :  { %v2496_v23 = vadd.f32 %v2482_v34, %v2471_v37  ;;  %2636 = vst [vmem:[#allocation14 + $0x10] sm:$0xff] %v2632_v33 }
 0x271   :  { %v3827_v46 = vmul.f32 -1.442695, %v2496_v23 }
 0x272   :  { %v2459_v47 = vpop.f32.mrf.mxu0 }
 0x273   :  { %4156 = vpow2.f32 %v3827_v46 }
 0x279   :  { %v4157_v39 = vpop.eup %4156 }
 0x27a   :  { %v2524_v48 = vadd.f32 1.0, %v4157_v39 }
 0x27c   :  { %4158 = vrcp.f32 %v2524_v48  ;;  %v2626_v52 = vand.u32 2147483648, %v2524_v48  ;;  %v2624_v54 = vand.u32 2147483647, %v2524_v48  ;;  %vm2620_vm11 = vweird.f32 %v2524_v48 }
 0x27e   :  { %v2627_v57 = vor.u32 1.1754944e-38, %v2626_v52  ;;  %vm2625_vm13 = vcmp.eq.f32.partialorder %v2624_v54, 8.507059e+37 }
 0x282   :  { %v4159_v50 = vpop.eup %4158 }
 0x283   :  { %v2616_v51 = vmul.f32 %v4159_v50, %v2524_v48  ;;  %vm2621_vm10 = vweird.f32 %v4159_v50 }
 0x284   :  { %vm2622_vm12 = vmor %vm2620_vm11, %vm2621_vm10 }
 0x285   :  { %v2617_v45 = vsub.f32 1.0, %v2616_v51 }
 0x287   :  { %v2618_v53 = vmul.f32 %v4159_v50, %v2617_v45 }
 0x289   :  { %v2619_v56 = vadd.f32 %v4159_v50, %v2618_v53 }
 0x28b   :  { %v2623_v49 = vsel %vm2622_vm12, %v4159_v50, %v2619_v56 }
 0x28c   :  { %v2628_v58 = vsel %vm2625_vm13, %v2627_v57, %v2623_v49 }
 0x28d   :  { %v2633_v59 = vpack.c.bf16 %v2628_v58, %v2628_v58 }
 0x28f   :  { %2638 = vst.msk [vmem:[#allocation14 + $0x18] sm:$0xf] %vm2637_vm14, %v2633_v59 }
 0x290   :  { %2649 = dma.vmem_to_hbm [thread:$0]  %s2645_s6, 448, %s2647_s15, [#allocation4]  }
 0x291   :  { %4360 = dma.done.wait [#allocation4], 448  }
 0x292   :  { %4361 = vsyncadd [#allocation4], 4294966848 }
 0x293   :  { %2654 = vsyncpa [#allocation3], 1 }
 0x294   :  { %2655 = vsyncpa [#allocation6], 1 }
 0x295   :  { %2656 = vsyncpa [#allocation9], 1 }
 0x296   :  { %2657 = vsyncpa [#allocation12], 1 }
 0x297   :  { %2658 = vsyncpa [#allocation4], 1 }

</bundles_post_ra>
